<compile_context>
chip_gen: v7x
topology: tpu7x:2x2x1
jax: 0.10.0
libtpu: 0.0.40
codegen_flags: <defaults>
</compile_context>

<pallas_src>
import math

import jax
import jax.numpy as jnp
from jax.experimental import pallas as pl
from jax.experimental.pallas import tpu as pltpu


def _round_up(x, m):
    return ((x + m - 1) // m) * m


# ----------------------------------------------------------------------------
# Kernel 1: row-tiled GEMM + bias  (used for x@W_ih+b precompute and final fc)
# ----------------------------------------------------------------------------
def _matmul_bias_kernel(x_ref, w_ref, b_ref, o_ref):
    x = x_ref[...].astype(jnp.bfloat16)          # bf16 operands, f32 accumulate
    o_ref[...] = (
        jnp.dot(x, w_ref[...], preferred_element_type=jnp.float32) + b_ref[...]
    ).astype(o_ref.dtype)


def matmul_bias(x, w_bf16, b_f32, *, tn=512):
    """(N, K) @ (K, M) + (1, M) -> (N, M) f32.  Rows tiled; weights resident."""
    N, K = x.shape
    M = w_bf16.shape[1]
    tn = min(tn, _round_up(N, 8))
    n_pad = _round_up(N, tn)
    if n_pad != N:
        x = jnp.pad(x, ((0, n_pad - N), (0, 0)))
    out = pl.pallas_call(
        _matmul_bias_kernel,
        out_shape=jax.ShapeDtypeStruct((n_pad, M), jnp.float32),
        grid_spec=pltpu.PrefetchScalarGridSpec(
            num_scalar_prefetch=0,
            grid=(n_pad // tn,),
            in_specs=[
                pl.BlockSpec((tn, K), lambda i: (i, 0)),
                pl.BlockSpec((K, M), lambda i: (0, 0)),   # constant index -> no re-DMA
                pl.BlockSpec((1, M), lambda i: (0, 0)),
            ],
            out_specs=pl.BlockSpec((tn, M), lambda i: (i, 0)),
        ),
        compiler_params=pltpu.CompilerParams(
            dimension_semantics=("parallel",),
        ),
    )(x, w_bf16, b_f32)
    return out[:N] if n_pad != N else out


# ----------------------------------------------------------------------------
# Kernel 2: LSTM recurrence.  gates_x (= x@W_ih + b) precomputed; only
# h_prev @ W_hh happens inside the time loop.
# ----------------------------------------------------------------------------
def _lstm_recurrent_kernel(gx_ref, whh_hbm_ref, out_ref, h_ref, c_ref, w_ref):
    t_blk = pl.program_id(1)

    @pl.when(t_blk == 0)
    def _():
        # Single-buffered resident weights: copy W_hh (bf16) from HBM into VMEM
        # scratch once per batch chunk; also reset h/c state.
        pltpu.sync_copy(whh_hbm_ref, w_ref)
        h_ref[...] = jnp.zeros(h_ref.shape, jnp.float32)
        c_ref[...] = jnp.zeros(c_ref.shape, jnp.float32)

    tc = gx_ref.shape[0]          # time steps in this chunk (static)
    hp = h_ref.shape[1]           # padded hidden size (multiple of 128)

    h = h_ref[...]
    c = c_ref[...]
    # Fully-unrolled inner time loop (tc <= 16): same codegen as
    # lax.fori_loop(..., unroll=True); h/c stay in vregs, scheduler sees all steps.
    for i in range(tc):
        gates = gx_ref[i] + jnp.dot(
            h.astype(jnp.bfloat16), w_ref[...],
            preferred_element_type=jnp.float32)          # (BB, 4*Hp) f32
        i_g = jax.nn.sigmoid(gates[:, 0 * hp:1 * hp])
        f_g = jax.nn.sigmoid(gates[:, 1 * hp:2 * hp])
        g_g = jnp.tanh(gates[:, 2 * hp:3 * hp])
        o_g = jax.nn.sigmoid(gates[:, 3 * hp:4 * hp])
        c = f_g * c + i_g * g_g
        h = o_g * jnp.tanh(c)
        out_ref[i] = h.astype(out_ref.dtype)
    h_ref[...] = h
    c_ref[...] = c


def lstm_layer(gates_x, w_hh_bf16, *, tc=16):
    """gates_x: (T, B, 4*Hp) f32 (bias already folded in); w_hh: (Hp, 4*Hp) bf16.
    Returns the hidden sequence (T, B, Hp) in bf16 (zero in padded lanes)."""
    T, B, four_hp = gates_x.shape
    hp = four_hp // 4

    tc = min(tc, T)
    t_pad = _round_up(T, tc)
    if t_pad != T:
        gates_x = jnp.pad(gates_x, ((0, t_pad - T), (0, 0), (0, 0)))

    # Batch-parallel leading grid axis: lets v7x's second TensorCore take an
    # independent batch chunk (the recurrence only serializes over time).
    nb = 2 if (B >= 32 and B % 32 == 0) else 1
    bb = B // nb

    # VMEM budget (sized for v7x's 64 MiB): single bf16 W_hh copy
    # + 2x(tc,bb,4Hp) f32 gate buffers + 2x(tc,bb,Hp) bf16 out buffers
    # + two (bb,Hp) f32 state slabs — tiny at these shapes.
    out = pl.pallas_call(
        _lstm_recurrent_kernel,
        out_shape=jax.ShapeDtypeStruct((t_pad, B, hp), jnp.bfloat16),
        grid_spec=pltpu.PrefetchScalarGridSpec(
            num_scalar_prefetch=0,
            grid=(nb, t_pad // tc),
            in_specs=[
                pl.BlockSpec((tc, bb, four_hp), lambda b, t: (t, b, 0)),
                pl.BlockSpec(memory_space=pl.ANY),     # W_hh stays in HBM
            ],
            out_specs=pl.BlockSpec((tc, bb, hp), lambda b, t: (t, b, 0)),
            scratch_shapes=[
                pltpu.VMEM((bb, hp), jnp.float32),        # h state
                pltpu.VMEM((bb, hp), jnp.float32),        # c state
                pltpu.VMEM((hp, four_hp), jnp.bfloat16),  # resident W_hh (1 copy)
            ],
        ),
        compiler_params=pltpu.CompilerParams(
            dimension_semantics=("parallel", "arbitrary"),
        ),
    )(gates_x, w_hh_bf16)
    return out[:T] if t_pad != T else out


# ----------------------------------------------------------------------------
# Parameter init (PyTorch-style) + kernel-friendly packing (padded, bf16).
# ----------------------------------------------------------------------------
def _scatter_gates(w_t, hp):
    """(D, 4H) -> (D, 4*hp): each gate's H columns placed at offset k*hp (rest 0)."""
    d, four_h = w_t.shape
    h = four_h // 4
    out = jnp.zeros((d, 4 * hp), w_t.dtype)
    for k in range(4):
        out = out.at[:, k * hp:k * hp + h].set(w_t[:, k * h:(k + 1) * h])
    return out


def init_lstm_params(key, input_dim, hidden_dim, num_layers, output_dim):
    hp = _round_up(hidden_dim, 128)            # lane-aligned hidden size
    bound = 1.0 / math.sqrt(hidden_dim)

    raw_layers = []
    for layer in range(num_layers):
        d_in = input_dim if layer == 0 else hidden_dim
        key, k1, k2, k3, k4 = jax.random.split(key, 5)
        w_ih = jax.random.uniform(k1, (4 * hidden_dim, d_in), jnp.float32, -bound, bound)
        w_hh = jax.random.uniform(k2, (4 * hidden_dim, hidden_dim), jnp.float32, -bound, bound)
        b_ih = jax.random.uniform(k3, (4 * hidden_dim,), jnp.float32, -bound, bound)
        b_hh = jax.random.uniform(k4, (4 * hidden_dim,), jnp.float32, -bound, bound)
        raw_layers.append((w_ih, w_hh, b_ih, b_hh))
    key, k1, k2 = jax.random.split(key, 3)
    fc_w = jax.random.uniform(k1, (output_dim, hidden_dim), jnp.float32, -bound, bound)
    fc_b = jax.random.uniform(k2, (output_dim,), jnp.float32, -bound, bound)

    params = {"layers": []}
    for layer, (w_ih, w_hh, b_ih, b_hh) in enumerate(raw_layers):
        d_in = input_dim if layer == 0 else hidden_dim
        w_ih_t = _scatter_gates(w_ih.T, hp)                      # (d_in, 4*hp)
        if layer > 0:                                            # pad input rows H -> hp
            w_ih_t = jnp.pad(w_ih_t, ((0, hp - hidden_dim), (0, 0)))
        w_hh_t = _scatter_gates(w_hh.T, hp)                      # (H, 4*hp)
        w_hh_t = jnp.pad(w_hh_t, ((0, hp - hidden_dim), (0, 0)))  # (hp, 4*hp)
        b = _scatter_gates((b_ih + b_hh)[None, :], hp)           # (1, 4*hp) f32
        params["layers"].append({
            "w_ih_t": w_ih_t.astype(jnp.bfloat16),
            "w_hh_t": w_hh_t.astype(jnp.bfloat16),
            "b": b,
        })
    params["fc_w_t"] = jnp.pad(fc_w.T, ((0, hp - hidden_dim), (0, 0))).astype(jnp.bfloat16)
    params["fc_b"] = fc_b[None, :]

    raw = {"layers": raw_layers, "fc_w": fc_w, "fc_b": fc_b}
    return params, raw


# ----------------------------------------------------------------------------
# Forward pass (matches the PyTorch module's forward).
# ----------------------------------------------------------------------------
@jax.jit
def lstm_forward(params, x_btd):
    """x_btd: (B, T, input_dim) -> (B, T, output_dim)."""
    B, T, _ = x_btd.shape
    act = jnp.transpose(x_btd, (1, 0, 2)).astype(jnp.float32)    # time-major (T, B, D)
    # TODO(synk): for small models, fuse all layers into one kernel keeping
    # inter-layer activations resident in VMEM (removes the per-layer HBM trip).
    for lp in params["layers"]:
        d = act.shape[-1]
        gx = matmul_bias(act.reshape(T * B, d), lp["w_ih_t"], lp["b"])   # (T*B, 4*Hp)
        gx = gx.reshape(T, B, -1)
        act = lstm_layer(gx, lp["w_hh_t"])                                # (T, B, Hp) bf16
    hp = act.shape[-1]
    y = matmul_bias(act.reshape(T * B, hp), params["fc_w_t"], params["fc_b"])  # (T*B, O)
    o = y.shape[-1]
    return jnp.transpose(y.reshape(T, B, o), (1, 0, 2))           # small transpose last


# ----------------------------------------------------------------------------
# Pure-JAX reference mirroring the kernel numerics (bf16 operands, f32 accum).
# ----------------------------------------------------------------------------
def lstm_reference(raw, x_btd):
    B, T, _ = x_btd.shape
    act = jnp.transpose(x_btd, (1, 0, 2)).astype(jnp.float32)
    for (w_ih, w_hh, b_ih, b_hh) in raw["layers"]:
        H = w_hh.shape[1]
        gx = jnp.dot(act.reshape(T * B, -1).astype(jnp.bfloat16),
                     w_ih.T.astype(jnp.bfloat16),
                     preferred_element_type=jnp.float32) + (b_ih + b_hh)
        gx = gx.reshape(T, B, 4 * H)
        w_hh_b = w_hh.T.astype(jnp.bfloat16)
        h = jnp.zeros((B, H), jnp.float32)
        c = jnp.zeros((B, H), jnp.float32)
        outs = []
        for t in range(T):
            gates = gx[t] + jnp.dot(h.astype(jnp.bfloat16), w_hh_b,
                                    preferred_element_type=jnp.float32)
            i_g = jax.nn.sigmoid(gates[:, 0 * H:1 * H])
            f_g = jax.nn.sigmoid(gates[:, 1 * H:2 * H])
            g_g = jnp.tanh(gates[:, 2 * H:3 * H])
            o_g = jax.nn.sigmoid(gates[:, 3 * H:4 * H])
            c = f_g * c + i_g * g_g
            h = o_g * jnp.tanh(c)
            outs.append(h.astype(jnp.bfloat16))
        act = jnp.stack(outs, axis=0)
    y = jnp.dot(act.reshape(T * B, -1).astype(jnp.bfloat16),
                raw["fc_w"].T.astype(jnp.bfloat16),
                preferred_element_type=jnp.float32) + raw["fc_b"]
    return jnp.transpose(y.reshape(T, B, -1), (1, 0, 2))


if __name__ == "__main__":
    B, T = 4, 8
    input_dim, hidden_dim, num_layers, output_dim = 8, 32, 2, 4

    key = jax.random.PRNGKey(0)
    k_params, k_x = jax.random.split(key)
    params, raw = init_lstm_params(k_params, input_dim, hidden_dim, num_layers, output_dim)
    x = jax.random.normal(k_x, (B, T, input_dim), jnp.float32)

    out = lstm_forward(params, x)
    jax.block_until_ready(out)
    assert out.shape == (B, T, output_dim), out.shape

    ref = lstm_reference(raw, x)
    err = float(jnp.max(jnp.abs(out - ref)))
    assert err < 2e-2, f"max abs err vs reference: {err}"
    print("KERNEL_OK")
</pallas_src>

<mosaic_0001>
module attributes {stable_mosaic.version = 11 : i64} {
  func.func @_matmul_bias_kernel(%arg0: i32, %arg1: memref<32x8xf32, #tpu.memory_space<vmem>>, %arg2: memref<8x512xbf16, #tpu.memory_space<vmem>>, %arg3: memref<1x512xf32, #tpu.memory_space<vmem>>, %arg4: memref<32x512xf32, #tpu.memory_space<vmem>>) attributes {dimension_semantics = [#tpu.dimension_semantics<parallel>], iteration_bounds = array<i64: 1>, scalar_prefetch = 0 : i64, scratch_operands = 0 : i64, tpu.core_type = #tpu.core_type<tc>, window_params = [{transform_indices = @transform_0, window_bounds = array<i64: 32, 8>}, {pipeline_mode = #tpu.pipeline_mode<synchronous>, transform_indices = @transform_1, window_bounds = array<i64: 8, 512>}, {pipeline_mode = #tpu.pipeline_mode<synchronous>, transform_indices = @transform_2, window_bounds = array<i64: 1, 512>}, {transform_indices = @transform_3, window_bounds = array<i64: 32, 512>}]} {
    %c0 = arith.constant 0 : index
    %c0_0 = arith.constant 0 : index
    %0 = vector.load %arg1[%c0, %c0_0] : memref<32x8xf32, #tpu.memory_space<vmem>>, vector<32x8xf32>
    %1 = arith.truncf %0 : vector<32x8xf32> to vector<32x8xbf16>
    %c0_1 = arith.constant 0 : index
    %c0_2 = arith.constant 0 : index
    %2 = vector.load %arg2[%c0_1, %c0_2] : memref<8x512xbf16, #tpu.memory_space<vmem>>, vector<8x512xbf16>
    %cst = arith.constant dense<0.000000e+00> : vector<32x512xf32>
    %3 = tpu.matmul %1, %2, %cst {dimension_numbers = #tpu.dot_dimension_numbers<[1], [0], [0], [1], [0, 0, 1, 1], [], []>} : vector<32x8xbf16>, vector<8x512xbf16>, vector<32x512xf32> -> vector<32x512xf32>
    %c0_3 = arith.constant 0 : index
    %c0_4 = arith.constant 0 : index
    %4 = vector.load %arg3[%c0_3, %c0_4] : memref<1x512xf32, #tpu.memory_space<vmem>>, vector<1x512xf32>
    %5 = vector.broadcast %4 : vector<1x512xf32> to vector<32x512xf32>
    %6 = arith.addf %3, %5 : vector<32x512xf32>
    %c0_5 = arith.constant 0 : index
    %c0_6 = arith.constant 0 : index
    %7 = vector.load %arg4[%c0_5, %c0_6] : memref<32x512xf32, #tpu.memory_space<vmem>>, vector<32x512xf32>
    tpu.vector_store %arg4[%c0_5, %c0_6], %6 {strides = array<i32>} : memref<32x512xf32, #tpu.memory_space<vmem>>, vector<32x512xf32>,
    return
  }
  func.func @transform_0(%arg0: i32) -> (i32, i32) {
    %c0_i32 = arith.constant 0 : i32
    %c0_i32_0 = arith.constant 0 : i32
    return %arg0, %c0_i32 : i32, i32
  }
  func.func @transform_1(%arg0: i32) -> (i32, i32) {
    %c0_i32 = arith.constant 0 : i32
    %c0_i32_0 = arith.constant 0 : i32
    %c0_i32_1 = arith.constant 0 : i32
    return %c0_i32, %c0_i32_0 : i32, i32
  }
  func.func @transform_2(%arg0: i32) -> (i32, i32) {
    %c0_i32 = arith.constant 0 : i32
    %c0_i32_0 = arith.constant 0 : i32
    %c0_i32_1 = arith.constant 0 : i32
    return %c0_i32, %c0_i32_0 : i32, i32
  }
  func.func @transform_3(%arg0: i32) -> (i32, i32) {
    %c0_i32 = arith.constant 0 : i32
    %c0_i32_0 = arith.constant 0 : i32
    return %arg0, %c0_i32 : i32, i32
  }
}

module attributes {stable_mosaic.version = 11 : i64} {
  func.func @_lstm_recurrent_kernel(%arg0: i32, %arg1: i32, %arg2: memref<8x4x512xf32, #tpu.memory_space<vmem>>, %arg3: memref<128x512xbf16, #tpu.memory_space<any>>, %arg4: memref<8x4x128xbf16, #tpu.memory_space<vmem>>, %arg5: memref<4x128xf32, #tpu.memory_space<vmem>>, %arg6: memref<4x128xf32, #tpu.memory_space<vmem>>, %arg7: memref<128x512xbf16, #tpu.memory_space<vmem>>) attributes {dimension_semantics = [#tpu.dimension_semantics<parallel>, #tpu.dimension_semantics<arbitrary>], iteration_bounds = array<i64: 1, 1>, scalar_prefetch = 0 : i64, scratch_operands = 3 : i64, tpu.core_type = #tpu.core_type<tc>, window_params = [{transform_indices = @transform_0, window_bounds = array<i64: 8, 4, 512>}, {}, {transform_indices = @transform_2, window_bounds = array<i64: 8, 4, 128>}]} {
    %c0_i32 = arith.constant 0 : i32
    %0 = arith.cmpi eq, %arg1, %c0_i32 : i32
    %1 = arith.extui %0 : i1 to i32
    %c0_i32_0 = arith.constant 0 : i32
    %2 = arith.cmpi ne, %1, %c0_i32_0 : i32
    scf.if %2 {
      "tpu.region"() ({
        %291 = tpu.sem_alloc : memref<!tpu.dma_semaphore, #tpu.memory_space<semaphore_mem>>
        tpu.enqueue_dma source(%arg3 : memref<128x512xbf16, #tpu.memory_space<any>>) target(%arg7 : memref<128x512xbf16, #tpu.memory_space<vmem>>) target_semaphore(%291 : memref<!tpu.dma_semaphore, #tpu.memory_space<semaphore_mem>>)
        tpu.wait_dma2 semaphore(%291 : memref<!tpu.dma_semaphore, #tpu.memory_space<semaphore_mem>>) src(%arg3 : memref<128x512xbf16, #tpu.memory_space<any>>) dst(%arg7 : memref<128x512xbf16, #tpu.memory_space<vmem>>)
        tpu.yield
      }) : () -> ()
      %cst_96 = arith.constant 0.000000e+00 : f32
      %287 = vector.broadcast %cst_96 : f32 to vector<4x128xf32>
      %c0_97 = arith.constant 0 : index
      %c0_98 = arith.constant 0 : index
      %288 = vector.load %arg5[%c0_97, %c0_98] : memref<4x128xf32, #tpu.memory_space<vmem>>, vector<4x128xf32>
      tpu.vector_store %arg5[%c0_97, %c0_98], %287 {strides = array<i32>} : memref<4x128xf32, #tpu.memory_space<vmem>>, vector<4x128xf32>,
      %cst_99 = arith.constant 0.000000e+00 : f32
      %289 = vector.broadcast %cst_99 : f32 to vector<4x128xf32>
      %c0_100 = arith.constant 0 : index
      %c0_101 = arith.constant 0 : index
      %290 = vector.load %arg6[%c0_100, %c0_101] : memref<4x128xf32, #tpu.memory_space<vmem>>, vector<4x128xf32>
      tpu.vector_store %arg6[%c0_100, %c0_101], %289 {strides = array<i32>} : memref<4x128xf32, #tpu.memory_space<vmem>>, vector<4x128xf32>,
    } else {
    }
    %c0 = arith.constant 0 : index
    %c0_1 = arith.constant 0 : index
    %3 = vector.load %arg5[%c0, %c0_1] : memref<4x128xf32, #tpu.memory_space<vmem>>, vector<4x128xf32>
    %c0_2 = arith.constant 0 : index
    %c0_3 = arith.constant 0 : index
    %4 = vector.load %arg6[%c0_2, %c0_3] : memref<4x128xf32, #tpu.memory_space<vmem>>, vector<4x128xf32>
    %c0_4 = arith.constant 0 : index
    %c0_5 = arith.constant 0 : index
    %c0_6 = arith.constant 0 : index
    %5 = vector.load %arg2[%c0_4, %c0_5, %c0_6] : memref<8x4x512xf32, #tpu.memory_space<vmem>>, vector<1x4x512xf32>
    %6 = vector.shape_cast %5 : vector<1x4x512xf32> to vector<4x512xf32>
    %7 = arith.truncf %3 : vector<4x128xf32> to vector<4x128xbf16>
    %c0_7 = arith.constant 0 : index
    %c0_8 = arith.constant 0 : index
    %8 = vector.load %arg7[%c0_7, %c0_8] : memref<128x512xbf16, #tpu.memory_space<vmem>>, vector<128x512xbf16>
    %cst = arith.constant dense<0.000000e+00> : vector<4x512xf32>
    %9 = tpu.matmul %7, %8, %cst {dimension_numbers = #tpu.dot_dimension_numbers<[1], [0], [0], [1], [0, 0, 1, 1], [], []>} : vector<4x128xbf16>, vector<128x512xbf16>, vector<4x512xf32> -> vector<4x512xf32>
    %10 = arith.addf %6, %9 : vector<4x512xf32>
    %11 = vector.extract_strided_slice %10 {offsets = [0, 0], sizes = [4, 128], strides = [1, 1]} : vector<4x512xf32> to vector<4x128xf32>
    %12 = arith.negf %11 : vector<4x128xf32>
    %13 = math.exp %12 : vector<4x128xf32>
    %cst_9 = arith.constant 1.000000e+00 : f32
    %14 = vector.broadcast %cst_9 : f32 to vector<4x128xf32>
    %15 = arith.addf %14, %13 : vector<4x128xf32>
    %16 = arith.divf %14, %15 : vector<4x128xf32>
    %17 = vector.extract_strided_slice %10 {offsets = [0, 128], sizes = [4, 128], strides = [1, 1]} : vector<4x512xf32> to vector<4x128xf32>
    %18 = arith.negf %17 : vector<4x128xf32>
    %19 = math.exp %18 : vector<4x128xf32>
    %cst_10 = arith.constant 1.000000e+00 : f32
    %20 = vector.broadcast %cst_10 : f32 to vector<4x128xf32>
    %21 = arith.addf %20, %19 : vector<4x128xf32>
    %22 = arith.divf %20, %21 : vector<4x128xf32>
    %23 = vector.extract_strided_slice %10 {offsets = [0, 256], sizes = [4, 128], strides = [1, 1]} : vector<4x512xf32> to vector<4x128xf32>
    %24 = math.tanh %23 : vector<4x128xf32>
    %25 = vector.extract_strided_slice %10 {offsets = [0, 384], sizes = [4, 128], strides = [1, 1]} : vector<4x512xf32> to vector<4x128xf32>
    %26 = arith.negf %25 : vector<4x128xf32>
    %27 = math.exp %26 : vector<4x128xf32>
    %cst_11 = arith.constant 1.000000e+00 : f32
    %28 = vector.broadcast %cst_11 : f32 to vector<4x128xf32>
    %29 = arith.addf %28, %27 : vector<4x128xf32>
    %30 = arith.divf %28, %29 : vector<4x128xf32>
    %31 = arith.mulf %22, %4 : vector<4x128xf32>
    %32 = arith.mulf %16, %24 : vector<4x128xf32>
    %33 = arith.addf %31, %32 : vector<4x128xf32>
    %34 = math.tanh %33 : vector<4x128xf32>
    %35 = arith.mulf %30, %34 : vector<4x128xf32>
    %36 = arith.truncf %35 : vector<4x128xf32> to vector<4x128xbf16>
    %c0_12 = arith.constant 0 : index
    %c0_13 = arith.constant 0 : index
    %c0_14 = arith.constant 0 : index
    %37 = vector.load %arg4[%c0_12, %c0_13, %c0_14] : memref<8x4x128xbf16, #tpu.memory_space<vmem>>, vector<1x4x128xbf16>
    %38 = vector.shape_cast %37 : vector<1x4x128xbf16> to vector<4x128xbf16>
    %39 = vector.shape_cast %36 : vector<4x128xbf16> to vector<1x4x128xbf16>
    tpu.vector_store %arg4[%c0_12, %c0_13, %c0_14], %39 {strides = array<i32>} : memref<8x4x128xbf16, #tpu.memory_space<vmem>>, vector<1x4x128xbf16>,
    %c1 = arith.constant 1 : index
    %c0_15 = arith.constant 0 : index
    %c0_16 = arith.constant 0 : index
    %40 = vector.load %arg2[%c1, %c0_15, %c0_16] : memref<8x4x512xf32, #tpu.memory_space<vmem>>, vector<1x4x512xf32>
    %41 = vector.shape_cast %40 : vector<1x4x512xf32> to vector<4x512xf32>
    %42 = arith.truncf %35 : vector<4x128xf32> to vector<4x128xbf16>
    %c0_17 = arith.constant 0 : index
    %c0_18 = arith.constant 0 : index
    %43 = vector.load %arg7[%c0_17, %c0_18] : memref<128x512xbf16, #tpu.memory_space<vmem>>, vector<128x512xbf16>
    %cst_19 = arith.constant dense<0.000000e+00> : vector<4x512xf32>
    %44 = tpu.matmul %42, %43, %cst_19 {dimension_numbers = #tpu.dot_dimension_numbers<[1], [0], [0], [1], [0, 0, 1, 1], [], []>} : vector<4x128xbf16>, vector<128x512xbf16>, vector<4x512xf32> -> vector<4x512xf32>
    %45 = arith.addf %41, %44 : vector<4x512xf32>
    %46 = vector.extract_strided_slice %45 {offsets = [0, 0], sizes = [4, 128], strides = [1, 1]} : vector<4x512xf32> to vector<4x128xf32>
    %47 = arith.negf %46 : vector<4x128xf32>
    %48 = math.exp %47 : vector<4x128xf32>
    %cst_20 = arith.constant 1.000000e+00 : f32
    %49 = vector.broadcast %cst_20 : f32 to vector<4x128xf32>
    %50 = arith.addf %49, %48 : vector<4x128xf32>
    %51 = arith.divf %49, %50 : vector<4x128xf32>
    %52 = vector.extract_strided_slice %45 {offsets = [0, 128], sizes = [4, 128], strides = [1, 1]} : vector<4x512xf32> to vector<4x128xf32>
    %53 = arith.negf %52 : vector<4x128xf32>
    %54 = math.exp %53 : vector<4x128xf32>
    %cst_21 = arith.constant 1.000000e+00 : f32
    %55 = vector.broadcast %cst_21 : f32 to vector<4x128xf32>
    %56 = arith.addf %55, %54 : vector<4x128xf32>
    %57 = arith.divf %55, %56 : vector<4x128xf32>
    %58 = vector.extract_strided_slice %45 {offsets = [0, 256], sizes = [4, 128], strides = [1, 1]} : vector<4x512xf32> to vector<4x128xf32>
    %59 = math.tanh %58 : vector<4x128xf32>
    %60 = vector.extract_strided_slice %45 {offsets = [0, 384], sizes = [4, 128], strides = [1, 1]} : vector<4x512xf32> to vector<4x128xf32>
    %61 = arith.negf %60 : vector<4x128xf32>
    %62 = math.exp %61 : vector<4x128xf32>
    %cst_22 = arith.constant 1.000000e+00 : f32
    %63 = vector.broadcast %cst_22 : f32 to vector<4x128xf32>
    %64 = arith.addf %63, %62 : vector<4x128xf32>
    %65 = arith.divf %63, %64 : vector<4x128xf32>
    %66 = arith.mulf %57, %33 : vector<4x128xf32>
    %67 = arith.mulf %51, %59 : vector<4x128xf32>
    %68 = arith.addf %66, %67 : vector<4x128xf32>
    %69 = math.tanh %68 : vector<4x128xf32>
    %70 = arith.mulf %65, %69 : vector<4x128xf32>
    %71 = arith.truncf %70 : vector<4x128xf32> to vector<4x128xbf16>
    %c1_23 = arith.constant 1 : index
    %c0_24 = arith.constant 0 : index
    %c0_25 = arith.constant 0 : index
    %72 = vector.load %arg4[%c1_23, %c0_24, %c0_25] : memref<8x4x128xbf16, #tpu.memory_space<vmem>>, vector<1x4x128xbf16>
    %73 = vector.shape_cast %72 : vector<1x4x128xbf16> to vector<4x128xbf16>
    %74 = vector.shape_cast %71 : vector<4x128xbf16> to vector<1x4x128xbf16>
    tpu.vector_store %arg4[%c1_23, %c0_24, %c0_25], %74 {strides = array<i32>} : memref<8x4x128xbf16, #tpu.memory_space<vmem>>, vector<1x4x128xbf16>,
    %c2 = arith.constant 2 : index
    %c0_26 = arith.constant 0 : index
    %c0_27 = arith.constant 0 : index
    %75 = vector.load %arg2[%c2, %c0_26, %c0_27] : memref<8x4x512xf32, #tpu.memory_space<vmem>>, vector<1x4x512xf32>
    %76 = vector.shape_cast %75 : vector<1x4x512xf32> to vector<4x512xf32>
    %77 = arith.truncf %70 : vector<4x128xf32> to vector<4x128xbf16>
    %c0_28 = arith.constant 0 : index
    %c0_29 = arith.constant 0 : index
    %78 = vector.load %arg7[%c0_28, %c0_29] : memref<128x512xbf16, #tpu.memory_space<vmem>>, vector<128x512xbf16>
    %cst_30 = arith.constant dense<0.000000e+00> : vector<4x512xf32>
    %79 = tpu.matmul %77, %78, %cst_30 {dimension_numbers = #tpu.dot_dimension_numbers<[1], [0], [0], [1], [0, 0, 1, 1], [], []>} : vector<4x128xbf16>, vector<128x512xbf16>, vector<4x512xf32> -> vector<4x512xf32>
    %80 = arith.addf %76, %79 : vector<4x512xf32>
    %81 = vector.extract_strided_slice %80 {offsets = [0, 0], sizes = [4, 128], strides = [1, 1]} : vector<4x512xf32> to vector<4x128xf32>
    %82 = arith.negf %81 : vector<4x128xf32>
    %83 = math.exp %82 : vector<4x128xf32>
    %cst_31 = arith.constant 1.000000e+00 : f32
    %84 = vector.broadcast %cst_31 : f32 to vector<4x128xf32>
    %85 = arith.addf %84, %83 : vector<4x128xf32>
    %86 = arith.divf %84, %85 : vector<4x128xf32>
    %87 = vector.extract_strided_slice %80 {offsets = [0, 128], sizes = [4, 128], strides = [1, 1]} : vector<4x512xf32> to vector<4x128xf32>
    %88 = arith.negf %87 : vector<4x128xf32>
    %89 = math.exp %88 : vector<4x128xf32>
    %cst_32 = arith.constant 1.000000e+00 : f32
    %90 = vector.broadcast %cst_32 : f32 to vector<4x128xf32>
    %91 = arith.addf %90, %89 : vector<4x128xf32>
    %92 = arith.divf %90, %91 : vector<4x128xf32>
    %93 = vector.extract_strided_slice %80 {offsets = [0, 256], sizes = [4, 128], strides = [1, 1]} : vector<4x512xf32> to vector<4x128xf32>
    %94 = math.tanh %93 : vector<4x128xf32>
    %95 = vector.extract_strided_slice %80 {offsets = [0, 384], sizes = [4, 128], strides = [1, 1]} : vector<4x512xf32> to vector<4x128xf32>
    %96 = arith.negf %95 : vector<4x128xf32>
    %97 = math.exp %96 : vector<4x128xf32>
    %cst_33 = arith.constant 1.000000e+00 : f32
    %98 = vector.broadcast %cst_33 : f32 to vector<4x128xf32>
    %99 = arith.addf %98, %97 : vector<4x128xf32>
    %100 = arith.divf %98, %99 : vector<4x128xf32>
    %101 = arith.mulf %92, %68 : vector<4x128xf32>
    %102 = arith.mulf %86, %94 : vector<4x128xf32>
    %103 = arith.addf %101, %102 : vector<4x128xf32>
    %104 = math.tanh %103 : vector<4x128xf32>
    %105 = arith.mulf %100, %104 : vector<4x128xf32>
    %106 = arith.truncf %105 : vector<4x128xf32> to vector<4x128xbf16>
    %c2_34 = arith.constant 2 : index
    %c0_35 = arith.constant 0 : index
    %c0_36 = arith.constant 0 : index
    %107 = vector.load %arg4[%c2_34, %c0_35, %c0_36] : memref<8x4x128xbf16, #tpu.memory_space<vmem>>, vector<1x4x128xbf16>
    %108 = vector.shape_cast %107 : vector<1x4x128xbf16> to vector<4x128xbf16>
    %109 = vector.shape_cast %106 : vector<4x128xbf16> to vector<1x4x128xbf16>
    tpu.vector_store %arg4[%c2_34, %c0_35, %c0_36], %109 {strides = array<i32>} : memref<8x4x128xbf16, #tpu.memory_space<vmem>>, vector<1x4x128xbf16>,
    %c3 = arith.constant 3 : index
    %c0_37 = arith.constant 0 : index
    %c0_38 = arith.constant 0 : index
    %110 = vector.load %arg2[%c3, %c0_37, %c0_38] : memref<8x4x512xf32, #tpu.memory_space<vmem>>, vector<1x4x512xf32>
    %111 = vector.shape_cast %110 : vector<1x4x512xf32> to vector<4x512xf32>
    %112 = arith.truncf %105 : vector<4x128xf32> to vector<4x128xbf16>
    %c0_39 = arith.constant 0 : index
    %c0_40 = arith.constant 0 : index
    %113 = vector.load %arg7[%c0_39, %c0_40] : memref<128x512xbf16, #tpu.memory_space<vmem>>, vector<128x512xbf16>
    %cst_41 = arith.constant dense<0.000000e+00> : vector<4x512xf32>
    %114 = tpu.matmul %112, %113, %cst_41 {dimension_numbers = #tpu.dot_dimension_numbers<[1], [0], [0], [1], [0, 0, 1, 1], [], []>} : vector<4x128xbf16>, vector<128x512xbf16>, vector<4x512xf32> -> vector<4x512xf32>
    %115 = arith.addf %111, %114 : vector<4x512xf32>
    %116 = vector.extract_strided_slice %115 {offsets = [0, 0], sizes = [4, 128], strides = [1, 1]} : vector<4x512xf32> to vector<4x128xf32>
    %117 = arith.negf %116 : vector<4x128xf32>
    %118 = math.exp %117 : vector<4x128xf32>
    %cst_42 = arith.constant 1.000000e+00 : f32
    %119 = vector.broadcast %cst_42 : f32 to vector<4x128xf32>
    %120 = arith.addf %119, %118 : vector<4x128xf32>
    %121 = arith.divf %119, %120 : vector<4x128xf32>
    %122 = vector.extract_strided_slice %115 {offsets = [0, 128], sizes = [4, 128], strides = [1, 1]} : vector<4x512xf32> to vector<4x128xf32>
    %123 = arith.negf %122 : vector<4x128xf32>
    %124 = math.exp %123 : vector<4x128xf32>
    %cst_43 = arith.constant 1.000000e+00 : f32
    %125 = vector.broadcast %cst_43 : f32 to vector<4x128xf32>
    %126 = arith.addf %125, %124 : vector<4x128xf32>
    %127 = arith.divf %125, %126 : vector<4x128xf32>
    %128 = vector.extract_strided_slice %115 {offsets = [0, 256], sizes = [4, 128], strides = [1, 1]} : vector<4x512xf32> to vector<4x128xf32>
    %129 = math.tanh %128 : vector<4x128xf32>
    %130 = vector.extract_strided_slice %115 {offsets = [0, 384], sizes = [4, 128], strides = [1, 1]} : vector<4x512xf32> to vector<4x128xf32>
    %131 = arith.negf %130 : vector<4x128xf32>
    %132 = math.exp %131 : vector<4x128xf32>
    %cst_44 = arith.constant 1.000000e+00 : f32
    %133 = vector.broadcast %cst_44 : f32 to vector<4x128xf32>
    %134 = arith.addf %133, %132 : vector<4x128xf32>
    %135 = arith.divf %133, %134 : vector<4x128xf32>
    %136 = arith.mulf %127, %103 : vector<4x128xf32>
    %137 = arith.mulf %121, %129 : vector<4x128xf32>
    %138 = arith.addf %136, %137 : vector<4x128xf32>
    %139 = math.tanh %138 : vector<4x128xf32>
    %140 = arith.mulf %135, %139 : vector<4x128xf32>
    %141 = arith.truncf %140 : vector<4x128xf32> to vector<4x128xbf16>
    %c3_45 = arith.constant 3 : index
    %c0_46 = arith.constant 0 : index
    %c0_47 = arith.constant 0 : index
    %142 = vector.load %arg4[%c3_45, %c0_46, %c0_47] : memref<8x4x128xbf16, #tpu.memory_space<vmem>>, vector<1x4x128xbf16>
    %143 = vector.shape_cast %142 : vector<1x4x128xbf16> to vector<4x128xbf16>
    %144 = vector.shape_cast %141 : vector<4x128xbf16> to vector<1x4x128xbf16>
    tpu.vector_store %arg4[%c3_45, %c0_46, %c0_47], %144 {strides = array<i32>} : memref<8x4x128xbf16, #tpu.memory_space<vmem>>, vector<1x4x128xbf16>,
    %c4 = arith.constant 4 : index
    %c0_48 = arith.constant 0 : index
    %c0_49 = arith.constant 0 : index
    %145 = vector.load %arg2[%c4, %c0_48, %c0_49] : memref<8x4x512xf32, #tpu.memory_space<vmem>>, vector<1x4x512xf32>
    %146 = vector.shape_cast %145 : vector<1x4x512xf32> to vector<4x512xf32>
    %147 = arith.truncf %140 : vector<4x128xf32> to vector<4x128xbf16>
    %c0_50 = arith.constant 0 : index
    %c0_51 = arith.constant 0 : index
    %148 = vector.load %arg7[%c0_50, %c0_51] : memref<128x512xbf16, #tpu.memory_space<vmem>>, vector<128x512xbf16>
    %cst_52 = arith.constant dense<0.000000e+00> : vector<4x512xf32>
    %149 = tpu.matmul %147, %148, %cst_52 {dimension_numbers = #tpu.dot_dimension_numbers<[1], [0], [0], [1], [0, 0, 1, 1], [], []>} : vector<4x128xbf16>, vector<128x512xbf16>, vector<4x512xf32> -> vector<4x512xf32>
    %150 = arith.addf %146, %149 : vector<4x512xf32>
    %151 = vector.extract_strided_slice %150 {offsets = [0, 0], sizes = [4, 128], strides = [1, 1]} : vector<4x512xf32> to vector<4x128xf32>
    %152 = arith.negf %151 : vector<4x128xf32>
    %153 = math.exp %152 : vector<4x128xf32>
    %cst_53 = arith.constant 1.000000e+00 : f32
    %154 = vector.broadcast %cst_53 : f32 to vector<4x128xf32>
    %155 = arith.addf %154, %153 : vector<4x128xf32>
    %156 = arith.divf %154, %155 : vector<4x128xf32>
    %157 = vector.extract_strided_slice %150 {offsets = [0, 128], sizes = [4, 128], strides = [1, 1]} : vector<4x512xf32> to vector<4x128xf32>
    %158 = arith.negf %157 : vector<4x128xf32>
    %159 = math.exp %158 : vector<4x128xf32>
    %cst_54 = arith.constant 1.000000e+00 : f32
    %160 = vector.broadcast %cst_54 : f32 to vector<4x128xf32>
    %161 = arith.addf %160, %159 : vector<4x128xf32>
    %162 = arith.divf %160, %161 : vector<4x128xf32>
    %163 = vector.extract_strided_slice %150 {offsets = [0, 256], sizes = [4, 128], strides = [1, 1]} : vector<4x512xf32> to vector<4x128xf32>
    %164 = math.tanh %163 : vector<4x128xf32>
    %165 = vector.extract_strided_slice %150 {offsets = [0, 384], sizes = [4, 128], strides = [1, 1]} : vector<4x512xf32> to vector<4x128xf32>
    %166 = arith.negf %165 : vector<4x128xf32>
    %167 = math.exp %166 : vector<4x128xf32>
    %cst_55 = arith.constant 1.000000e+00 : f32
    %168 = vector.broadcast %cst_55 : f32 to vector<4x128xf32>
    %169 = arith.addf %168, %167 : vector<4x128xf32>
    %170 = arith.divf %168, %169 : vector<4x128xf32>
    %171 = arith.mulf %162, %138 : vector<4x128xf32>
    %172 = arith.mulf %156, %164 : vector<4x128xf32>
    %173 = arith.addf %171, %172 : vector<4x128xf32>
    %174 = math.tanh %173 : vector<4x128xf32>
    %175 = arith.mulf %170, %174 : vector<4x128xf32>
    %176 = arith.truncf %175 : vector<4x128xf32> to vector<4x128xbf16>
    %c4_56 = arith.constant 4 : index
    %c0_57 = arith.constant 0 : index
    %c0_58 = arith.constant 0 : index
    %177 = vector.load %arg4[%c4_56, %c0_57, %c0_58] : memref<8x4x128xbf16, #tpu.memory_space<vmem>>, vector<1x4x128xbf16>
    %178 = vector.shape_cast %177 : vector<1x4x128xbf16> to vector<4x128xbf16>
    %179 = vector.shape_cast %176 : vector<4x128xbf16> to vector<1x4x128xbf16>
    tpu.vector_store %arg4[%c4_56, %c0_57, %c0_58], %179 {strides = array<i32>} : memref<8x4x128xbf16, #tpu.memory_space<vmem>>, vector<1x4x128xbf16>,
    %c5 = arith.constant 5 : index
    %c0_59 = arith.constant 0 : index
    %c0_60 = arith.constant 0 : index
    %180 = vector.load %arg2[%c5, %c0_59, %c0_60] : memref<8x4x512xf32, #tpu.memory_space<vmem>>, vector<1x4x512xf32>
    %181 = vector.shape_cast %180 : vector<1x4x512xf32> to vector<4x512xf32>
    %182 = arith.truncf %175 : vector<4x128xf32> to vector<4x128xbf16>
    %c0_61 = arith.constant 0 : index
    %c0_62 = arith.constant 0 : index
    %183 = vector.load %arg7[%c0_61, %c0_62] : memref<128x512xbf16, #tpu.memory_space<vmem>>, vector<128x512xbf16>
    %cst_63 = arith.constant dense<0.000000e+00> : vector<4x512xf32>
    %184 = tpu.matmul %182, %183, %cst_63 {dimension_numbers = #tpu.dot_dimension_numbers<[1], [0], [0], [1], [0, 0, 1, 1], [], []>} : vector<4x128xbf16>, vector<128x512xbf16>, vector<4x512xf32> -> vector<4x512xf32>
    %185 = arith.addf %181, %184 : vector<4x512xf32>
    %186 = vector.extract_strided_slice %185 {offsets = [0, 0], sizes = [4, 128], strides = [1, 1]} : vector<4x512xf32> to vector<4x128xf32>
    %187 = arith.negf %186 : vector<4x128xf32>
    %188 = math.exp %187 : vector<4x128xf32>
    %cst_64 = arith.constant 1.000000e+00 : f32
    %189 = vector.broadcast %cst_64 : f32 to vector<4x128xf32>
    %190 = arith.addf %189, %188 : vector<4x128xf32>
    %191 = arith.divf %189, %190 : vector<4x128xf32>
    %192 = vector.extract_strided_slice %185 {offsets = [0, 128], sizes = [4, 128], strides = [1, 1]} : vector<4x512xf32> to vector<4x128xf32>
    %193 = arith.negf %192 : vector<4x128xf32>
    %194 = math.exp %193 : vector<4x128xf32>
    %cst_65 = arith.constant 1.000000e+00 : f32
    %195 = vector.broadcast %cst_65 : f32 to vector<4x128xf32>
    %196 = arith.addf %195, %194 : vector<4x128xf32>
    %197 = arith.divf %195, %196 : vector<4x128xf32>
    %198 = vector.extract_strided_slice %185 {offsets = [0, 256], sizes = [4, 128], strides = [1, 1]} : vector<4x512xf32> to vector<4x128xf32>
    %199 = math.tanh %198 : vector<4x128xf32>
    %200 = vector.extract_strided_slice %185 {offsets = [0, 384], sizes = [4, 128], strides = [1, 1]} : vector<4x512xf32> to vector<4x128xf32>
    %201 = arith.negf %200 : vector<4x128xf32>
    %202 = math.exp %201 : vector<4x128xf32>
    %cst_66 = arith.constant 1.000000e+00 : f32
    %203 = vector.broadcast %cst_66 : f32 to vector<4x128xf32>
    %204 = arith.addf %203, %202 : vector<4x128xf32>
    %205 = arith.divf %203, %204 : vector<4x128xf32>
    %206 = arith.mulf %197, %173 : vector<4x128xf32>
    %207 = arith.mulf %191, %199 : vector<4x128xf32>
    %208 = arith.addf %206, %207 : vector<4x128xf32>
    %209 = math.tanh %208 : vector<4x128xf32>
    %210 = arith.mulf %205, %209 : vector<4x128xf32>
    %211 = arith.truncf %210 : vector<4x128xf32> to vector<4x128xbf16>
    %c5_67 = arith.constant 5 : index
    %c0_68 = arith.constant 0 : index
    %c0_69 = arith.constant 0 : index
    %212 = vector.load %arg4[%c5_67, %c0_68, %c0_69] : memref<8x4x128xbf16, #tpu.memory_space<vmem>>, vector<1x4x128xbf16>
    %213 = vector.shape_cast %212 : vector<1x4x128xbf16> to vector<4x128xbf16>
    %214 = vector.shape_cast %211 : vector<4x128xbf16> to vector<1x4x128xbf16>
    tpu.vector_store %arg4[%c5_67, %c0_68, %c0_69], %214 {strides = array<i32>} : memref<8x4x128xbf16, #tpu.memory_space<vmem>>, vector<1x4x128xbf16>,
    %c6 = arith.constant 6 : index
    %c0_70 = arith.constant 0 : index
    %c0_71 = arith.constant 0 : index
    %215 = vector.load %arg2[%c6, %c0_70, %c0_71] : memref<8x4x512xf32, #tpu.memory_space<vmem>>, vector<1x4x512xf32>
    %216 = vector.shape_cast %215 : vector<1x4x512xf32> to vector<4x512xf32>
    %217 = arith.truncf %210 : vector<4x128xf32> to vector<4x128xbf16>
    %c0_72 = arith.constant 0 : index
    %c0_73 = arith.constant 0 : index
    %218 = vector.load %arg7[%c0_72, %c0_73] : memref<128x512xbf16, #tpu.memory_space<vmem>>, vector<128x512xbf16>
    %cst_74 = arith.constant dense<0.000000e+00> : vector<4x512xf32>
    %219 = tpu.matmul %217, %218, %cst_74 {dimension_numbers = #tpu.dot_dimension_numbers<[1], [0], [0], [1], [0, 0, 1, 1], [], []>} : vector<4x128xbf16>, vector<128x512xbf16>, vector<4x512xf32> -> vector<4x512xf32>
    %220 = arith.addf %216, %219 : vector<4x512xf32>
    %221 = vector.extract_strided_slice %220 {offsets = [0, 0], sizes = [4, 128], strides = [1, 1]} : vector<4x512xf32> to vector<4x128xf32>
    %222 = arith.negf %221 : vector<4x128xf32>
    %223 = math.exp %222 : vector<4x128xf32>
    %cst_75 = arith.constant 1.000000e+00 : f32
    %224 = vector.broadcast %cst_75 : f32 to vector<4x128xf32>
    %225 = arith.addf %224, %223 : vector<4x128xf32>
    %226 = arith.divf %224, %225 : vector<4x128xf32>
    %227 = vector.extract_strided_slice %220 {offsets = [0, 128], sizes = [4, 128], strides = [1, 1]} : vector<4x512xf32> to vector<4x128xf32>
    %228 = arith.negf %227 : vector<4x128xf32>
    %229 = math.exp %228 : vector<4x128xf32>
    %cst_76 = arith.constant 1.000000e+00 : f32
    %230 = vector.broadcast %cst_76 : f32 to vector<4x128xf32>
    %231 = arith.addf %230, %229 : vector<4x128xf32>
    %232 = arith.divf %230, %231 : vector<4x128xf32>
    %233 = vector.extract_strided_slice %220 {offsets = [0, 256], sizes = [4, 128], strides = [1, 1]} : vector<4x512xf32> to vector<4x128xf32>
    %234 = math.tanh %233 : vector<4x128xf32>
    %235 = vector.extract_strided_slice %220 {offsets = [0, 384], sizes = [4, 128], strides = [1, 1]} : vector<4x512xf32> to vector<4x128xf32>
    %236 = arith.negf %235 : vector<4x128xf32>
    %237 = math.exp %236 : vector<4x128xf32>
    %cst_77 = arith.constant 1.000000e+00 : f32
    %238 = vector.broadcast %cst_77 : f32 to vector<4x128xf32>
    %239 = arith.addf %238, %237 : vector<4x128xf32>
    %240 = arith.divf %238, %239 : vector<4x128xf32>
    %241 = arith.mulf %232, %208 : vector<4x128xf32>
    %242 = arith.mulf %226, %234 : vector<4x128xf32>
    %243 = arith.addf %241, %242 : vector<4x128xf32>
    %244 = math.tanh %243 : vector<4x128xf32>
    %245 = arith.mulf %240, %244 : vector<4x128xf32>
    %246 = arith.truncf %245 : vector<4x128xf32> to vector<4x128xbf16>
    %c6_78 = arith.constant 6 : index
    %c0_79 = arith.constant 0 : index
    %c0_80 = arith.constant 0 : index
    %247 = vector.load %arg4[%c6_78, %c0_79, %c0_80] : memref<8x4x128xbf16, #tpu.memory_space<vmem>>, vector<1x4x128xbf16>
    %248 = vector.shape_cast %247 : vector<1x4x128xbf16> to vector<4x128xbf16>
    %249 = vector.shape_cast %246 : vector<4x128xbf16> to vector<1x4x128xbf16>
    tpu.vector_store %arg4[%c6_78, %c0_79, %c0_80], %249 {strides = array<i32>} : memref<8x4x128xbf16, #tpu.memory_space<vmem>>, vector<1x4x128xbf16>,
    %c7 = arith.constant 7 : index
    %c0_81 = arith.constant 0 : index
    %c0_82 = arith.constant 0 : index
    %250 = vector.load %arg2[%c7, %c0_81, %c0_82] : memref<8x4x512xf32, #tpu.memory_space<vmem>>, vector<1x4x512xf32>
    %251 = vector.shape_cast %250 : vector<1x4x512xf32> to vector<4x512xf32>
    %252 = arith.truncf %245 : vector<4x128xf32> to vector<4x128xbf16>
    %c0_83 = arith.constant 0 : index
    %c0_84 = arith.constant 0 : index
    %253 = vector.load %arg7[%c0_83, %c0_84] : memref<128x512xbf16, #tpu.memory_space<vmem>>, vector<128x512xbf16>
    %cst_85 = arith.constant dense<0.000000e+00> : vector<4x512xf32>
    %254 = tpu.matmul %252, %253, %cst_85 {dimension_numbers = #tpu.dot_dimension_numbers<[1], [0], [0], [1], [0, 0, 1, 1], [], []>} : vector<4x128xbf16>, vector<128x512xbf16>, vector<4x512xf32> -> vector<4x512xf32>
    %255 = arith.addf %251, %254 : vector<4x512xf32>
    %256 = vector.extract_strided_slice %255 {offsets = [0, 0], sizes = [4, 128], strides = [1, 1]} : vector<4x512xf32> to vector<4x128xf32>
    %257 = arith.negf %256 : vector<4x128xf32>
    %258 = math.exp %257 : vector<4x128xf32>
    %cst_86 = arith.constant 1.000000e+00 : f32
    %259 = vector.broadcast %cst_86 : f32 to vector<4x128xf32>
    %260 = arith.addf %259, %258 : vector<4x128xf32>
    %261 = arith.divf %259, %260 : vector<4x128xf32>
    %262 = vector.extract_strided_slice %255 {offsets = [0, 128], sizes = [4, 128], strides = [1, 1]} : vector<4x512xf32> to vector<4x128xf32>
    %263 = arith.negf %262 : vector<4x128xf32>
    %264 = math.exp %263 : vector<4x128xf32>
    %cst_87 = arith.constant 1.000000e+00 : f32
    %265 = vector.broadcast %cst_87 : f32 to vector<4x128xf32>
    %266 = arith.addf %265, %264 : vector<4x128xf32>
    %267 = arith.divf %265, %266 : vector<4x128xf32>
    %268 = vector.extract_strided_slice %255 {offsets = [0, 256], sizes = [4, 128], strides = [1, 1]} : vector<4x512xf32> to vector<4x128xf32>
    %269 = math.tanh %268 : vector<4x128xf32>
    %270 = vector.extract_strided_slice %255 {offsets = [0, 384], sizes = [4, 128], strides = [1, 1]} : vector<4x512xf32> to vector<4x128xf32>
    %271 = arith.negf %270 : vector<4x128xf32>
    %272 = math.exp %271 : vector<4x128xf32>
    %cst_88 = arith.constant 1.000000e+00 : f32
    %273 = vector.broadcast %cst_88 : f32 to vector<4x128xf32>
    %274 = arith.addf %273, %272 : vector<4x128xf32>
    %275 = arith.divf %273, %274 : vector<4x128xf32>
    %276 = arith.mulf %267, %243 : vector<4x128xf32>
    %277 = arith.mulf %261, %269 : vector<4x128xf32>
    %278 = arith.addf %276, %277 : vector<4x128xf32>
    %279 = math.tanh %278 : vector<4x128xf32>
    %280 = arith.mulf %275, %279 : vector<4x128xf32>
    %281 = arith.truncf %280 : vector<4x128xf32> to vector<4x128xbf16>
    %c7_89 = arith.constant 7 : index
    %c0_90 = arith.constant 0 : index
    %c0_91 = arith.constant 0 : index
    %282 = vector.load %arg4[%c7_89, %c0_90, %c0_91] : memref<8x4x128xbf16, #tpu.memory_space<vmem>>, vector<1x4x128xbf16>
    %283 = vector.shape_cast %282 : vector<1x4x128xbf16> to vector<4x128xbf16>
    %284 = vector.shape_cast %281 : vector<4x128xbf16> to vector<1x4x128xbf16>
    tpu.vector_store %arg4[%c7_89, %c0_90, %c0_91], %284 {strides = array<i32>} : memref<8x4x128xbf16, #tpu.memory_space<vmem>>, vector<1x4x128xbf16>,
    %c0_92 = arith.constant 0 : index
    %c0_93 = arith.constant 0 : index
    %285 = vector.load %arg5[%c0_92, %c0_93] : memref<4x128xf32, #tpu.memory_space<vmem>>, vector<4x128xf32>
    tpu.vector_store %arg5[%c0_92, %c0_93], %280 {strides = array<i32>} : memref<4x128xf32, #tpu.memory_space<vmem>>, vector<4x128xf32>,
    %c0_94 = arith.constant 0 : index
    %c0_95 = arith.constant 0 : index
    %286 = vector.load %arg6[%c0_94, %c0_95] : memref<4x128xf32, #tpu.memory_space<vmem>>, vector<4x128xf32>
    tpu.vector_store %arg6[%c0_94, %c0_95], %278 {strides = array<i32>} : memref<4x128xf32, #tpu.memory_space<vmem>>, vector<4x128xf32>,
    return
  }
  func.func @transform_0(%arg0: i32, %arg1: i32) -> (i32, i32, i32) {
    %c0_i32 = arith.constant 0 : i32
    %c0_i32_0 = arith.constant 0 : i32
    return %arg1, %arg0, %c0_i32 : i32, i32, i32
  }
  func.func @transform_2(%arg0: i32, %arg1: i32) -> (i32, i32, i32) {
    %c0_i32 = arith.constant 0 : i32
    %c0_i32_0 = arith.constant 0 : i32
    return %arg1, %arg0, %c0_i32 : i32, i32, i32
  }
}

module attributes {stable_mosaic.version = 11 : i64} {
  func.func @_matmul_bias_kernel(%arg0: i32, %arg1: memref<32x128xbf16, #tpu.memory_space<vmem>>, %arg2: memref<128x512xbf16, #tpu.memory_space<vmem>>, %arg3: memref<1x512xf32, #tpu.memory_space<vmem>>, %arg4: memref<32x512xf32, #tpu.memory_space<vmem>>) attributes {dimension_semantics = [#tpu.dimension_semantics<parallel>], iteration_bounds = array<i64: 1>, scalar_prefetch = 0 : i64, scratch_operands = 0 : i64, tpu.core_type = #tpu.core_type<tc>, window_params = [{transform_indices = @transform_0, window_bounds = array<i64: 32, 128>}, {pipeline_mode = #tpu.pipeline_mode<synchronous>, transform_indices = @transform_1, window_bounds = array<i64: 128, 512>}, {pipeline_mode = #tpu.pipeline_mode<synchronous>, transform_indices = @transform_2, window_bounds = array<i64: 1, 512>}, {transform_indices = @transform_3, window_bounds = array<i64: 32, 512>}]} {
    %c0 = arith.constant 0 : index
    %c0_0 = arith.constant 0 : index
    %0 = vector.load %arg1[%c0, %c0_0] : memref<32x128xbf16, #tpu.memory_space<vmem>>, vector<32x128xbf16>
    %c0_1 = arith.constant 0 : index
    %c0_2 = arith.constant 0 : index
    %1 = vector.load %arg2[%c0_1, %c0_2] : memref<128x512xbf16, #tpu.memory_space<vmem>>, vector<128x512xbf16>
    %cst = arith.constant dense<0.000000e+00> : vector<32x512xf32>
    %2 = tpu.matmul %0, %1, %cst {dimension_numbers = #tpu.dot_dimension_numbers<[1], [0], [0], [1], [0, 0, 1, 1], [], []>} : vector<32x128xbf16>, vector<128x512xbf16>, vector<32x512xf32> -> vector<32x512xf32>
    %c0_3 = arith.constant 0 : index
    %c0_4 = arith.constant 0 : index
    %3 = vector.load %arg3[%c0_3, %c0_4] : memref<1x512xf32, #tpu.memory_space<vmem>>, vector<1x512xf32>
    %4 = vector.broadcast %3 : vector<1x512xf32> to vector<32x512xf32>
    %5 = arith.addf %2, %4 : vector<32x512xf32>
    %c0_5 = arith.constant 0 : index
    %c0_6 = arith.constant 0 : index
    %6 = vector.load %arg4[%c0_5, %c0_6] : memref<32x512xf32, #tpu.memory_space<vmem>>, vector<32x512xf32>
    tpu.vector_store %arg4[%c0_5, %c0_6], %5 {strides = array<i32>} : memref<32x512xf32, #tpu.memory_space<vmem>>, vector<32x512xf32>,
    return
  }
  func.func @transform_0(%arg0: i32) -> (i32, i32) {
    %c0_i32 = arith.constant 0 : i32
    %c0_i32_0 = arith.constant 0 : i32
    return %arg0, %c0_i32 : i32, i32
  }
  func.func @transform_1(%arg0: i32) -> (i32, i32) {
    %c0_i32 = arith.constant 0 : i32
    %c0_i32_0 = arith.constant 0 : i32
    %c0_i32_1 = arith.constant 0 : i32
    return %c0_i32, %c0_i32_0 : i32, i32
  }
  func.func @transform_2(%arg0: i32) -> (i32, i32) {
    %c0_i32 = arith.constant 0 : i32
    %c0_i32_0 = arith.constant 0 : i32
    %c0_i32_1 = arith.constant 0 : i32
    return %c0_i32, %c0_i32_0 : i32, i32
  }
  func.func @transform_3(%arg0: i32) -> (i32, i32) {
    %c0_i32 = arith.constant 0 : i32
    %c0_i32_0 = arith.constant 0 : i32
    return %arg0, %c0_i32 : i32, i32
  }
}

module attributes {stable_mosaic.version = 11 : i64} {
  func.func @_matmul_bias_kernel(%arg0: i32, %arg1: memref<32x128xbf16, #tpu.memory_space<vmem>>, %arg2: memref<128x4xbf16, #tpu.memory_space<vmem>>, %arg3: memref<1x4xf32, #tpu.memory_space<vmem>>, %arg4: memref<32x4xf32, #tpu.memory_space<vmem>>) attributes {dimension_semantics = [#tpu.dimension_semantics<parallel>], iteration_bounds = array<i64: 1>, scalar_prefetch = 0 : i64, scratch_operands = 0 : i64, tpu.core_type = #tpu.core_type<tc>, window_params = [{transform_indices = @transform_0, window_bounds = array<i64: 32, 128>}, {pipeline_mode = #tpu.pipeline_mode<synchronous>, transform_indices = @transform_1, window_bounds = array<i64: 128, 4>}, {pipeline_mode = #tpu.pipeline_mode<synchronous>, transform_indices = @transform_2, window_bounds = array<i64: 1, 4>}, {transform_indices = @transform_3, window_bounds = array<i64: 32, 4>}]} {
    %c0 = arith.constant 0 : index
    %c0_0 = arith.constant 0 : index
    %0 = vector.load %arg1[%c0, %c0_0] : memref<32x128xbf16, #tpu.memory_space<vmem>>, vector<32x128xbf16>
    %c0_1 = arith.constant 0 : index
    %c0_2 = arith.constant 0 : index
    %1 = vector.load %arg2[%c0_1, %c0_2] : memref<128x4xbf16, #tpu.memory_space<vmem>>, vector<128x4xbf16>
    %cst = arith.constant dense<0.000000e+00> : vector<32x4xf32>
    %2 = tpu.matmul %0, %1, %cst {dimension_numbers = #tpu.dot_dimension_numbers<[1], [0], [0], [1], [0, 0, 1, 1], [], []>} : vector<32x128xbf16>, vector<128x4xbf16>, vector<32x4xf32> -> vector<32x4xf32>
    %c0_3 = arith.constant 0 : index
    %c0_4 = arith.constant 0 : index
    %3 = vector.load %arg3[%c0_3, %c0_4] : memref<1x4xf32, #tpu.memory_space<vmem>>, vector<1x4xf32>
    %4 = vector.broadcast %3 : vector<1x4xf32> to vector<32x4xf32>
    %5 = arith.addf %2, %4 : vector<32x4xf32>
    %c0_5 = arith.constant 0 : index
    %c0_6 = arith.constant 0 : index
    %6 = vector.load %arg4[%c0_5, %c0_6] : memref<32x4xf32, #tpu.memory_space<vmem>>, vector<32x4xf32>
    tpu.vector_store %arg4[%c0_5, %c0_6], %5 {strides = array<i32>} : memref<32x4xf32, #tpu.memory_space<vmem>>, vector<32x4xf32>,
    return
  }
  func.func @transform_0(%arg0: i32) -> (i32, i32) {
    %c0_i32 = arith.constant 0 : i32
    %c0_i32_0 = arith.constant 0 : i32
    return %arg0, %c0_i32 : i32, i32
  }
  func.func @transform_1(%arg0: i32) -> (i32, i32) {
    %c0_i32 = arith.constant 0 : i32
    %c0_i32_0 = arith.constant 0 : i32
    %c0_i32_1 = arith.constant 0 : i32
    return %c0_i32, %c0_i32_0 : i32, i32
  }
  func.func @transform_2(%arg0: i32) -> (i32, i32) {
    %c0_i32 = arith.constant 0 : i32
    %c0_i32_0 = arith.constant 0 : i32
    %c0_i32_1 = arith.constant 0 : i32
    return %c0_i32, %c0_i32_0 : i32, i32
  }
  func.func @transform_3(%arg0: i32) -> (i32, i32) {
    %c0_i32 = arith.constant 0 : i32
    %c0_i32_0 = arith.constant 0 : i32
    return %arg0, %c0_i32 : i32, i32
  }
}

</mosaic_0001>

<bundles_post_ra>
// kernel: lstm_forward.5
= control target key start
LH: loop header
LB: loop body
LE: loop exit
PB: predicated region body
PF: predicated region fallthrough
CT: control target
= control target key end

     0   :  { %vm62_vm0 = vcmask 1043456   ;;  %v216_v2 = vmov 0   ;;  %vm55_vm1 = vcmask 64512   ;;  %v25_v15 = vlaneseq  ;;  %s306_s1 = inlined_call_operand.vmem [shape: bf16[8,512], index: 1, kind: input, shape index: {}]   ;;  %s307_s0 = inlined_call_operand.vmem [shape: f32[32,8], index: 0, kind: input, shape index: {}]   ;;  %s308_s2 = inlined_call_operand.vmem [shape: f32[1,512], index: 2, kind: input, shape index: {}]   ;;  %s309_s3 = inlined_call_operand.vmem [shape: f32[32,512], index: 3, kind: output, shape index: {}]  }
   0x1   :  { %v21_v0 = vld [vmem:[%s306_s1] sm:$0xff]  ;;  %v22_v1 = vld [vmem:[%s306_s1 + $0x8] sm:$0xff]  ;;  %107 = vmatprep.mubr.bf16.mxu0 %v216_v2  ;;  %160 = vmatprep.mubr.bf16.mxu1 %v216_v2  ;;  %v17_v12 = vld [vmem:[%s307_s0 + $0x10] sm:$0xff] }
   0x2   :  { %v15_v3 = vld [vmem:[%s307_s0] sm:$0xff]  ;;  %v202_v4 = vcombine.high %v21_v0, %v21_v0  ;;  %v204_v5 = vcombine.high %v22_v1, %v22_v1  ;;  %v201_v6 = vcombine.low %v21_v0, %v21_v0  ;;  %v203_v7 = vcombine.low %v22_v1, %v22_v1  ;;  %v16_v8 = vld [vmem:[%s307_s0 + $0x8] sm:$0xff]  ;;  %v18_v13 = vld [vmem:[%s307_s0 + $0x18] sm:$0xff] }
   0x3   :  { %v19_v11 = vpack.c.bf16 %v16_v8, %v15_v3  ;;  %v20_v14 = vpack.c.bf16 %v18_v13, %v17_v12  ;;  %v26_v16 = vshrl.u32 %v25_v15, 7  ;;  %v23_v19 = vld [vmem:[%s308_s2] sm:$0xf] }
   0x4   :  { %205 = vmatprep.subr.msk.bf16.mxu0 %vm62_vm0, %v202_v4  ;;  %208 = vmatprep.subr.msk.bf16.mxu1 %vm62_vm0, %v204_v5  ;;  %v64_v9 = vsel %vm62_vm0, %v201_v6, 0  ;;  %v70_v10 = vsel %vm62_vm0, %v203_v7, 0 }
   0x5   :  { %76 = vmatpush1.bf16.msra.mxu0 %v64_v9  ;;  %129 = vmatpush1.bf16.msra.mxu1 %v70_v10  ;;  %v27_v17 = vsub.s32 0, %v26_v16  ;;  %v35_v18 = vsub.s32 2, %v26_v16  ;;  %v31_v20 = vsub.s32 1, %v26_v16  ;;  %v39_v21 = vsub.s32 3, %v26_v16 }
   0x7   :  { %v28_v22 = vrot.slane %v23_v19, %v27_v17  ;;  %v36_v23 = vrot.slane %v23_v19, %v35_v18  ;;  %v32_v24 = vrot.slane %v23_v19, %v31_v20  ;;  %v40_v25 = vrot.slane %v23_v19, %v39_v21 }
   0x8   :  { %206 = vmatmul.mubr.msk.bf16.vlgmr.msra.gmra.mrb[0].mxu0 %vm55_vm1, %v19_v11  ;;  %209 = vmatmul.mubr.msk.bf16.vlgmr.msra.gmra.mrb[0].mxu1 %vm55_vm1, %v19_v11 }
   0x9   :  { %117 = vmatprep.mubr.bf16.mxu0 %v216_v2  ;;  %170 = vmatprep.mubr.bf16.mxu1 %v216_v2 }
  0x10   :  { %207 = vmatmul.mubr.msk.bf16.gmra.mrb[4].mxu0 %vm55_vm1, %v20_v14  ;;  %210 = vmatmul.mubr.msk.bf16.gmra.mrb[4].mxu1 %vm55_vm1, %v20_v14 }
  0xdb   :  { %v109_v26 = vpop.f32.mrb[0].mxu0  ;;  %v162_v27 = vpop.f32.mrb[0].mxu1 }
  0xdc   :  { %v110_v28 = vadd.f32 %v109_v26, %v28_v22  ;;  %v163_v29 = vadd.f32 %v162_v27, %v36_v23  ;;  %v111_v30 = vpop.f32.mrb[1].mxu0  ;;  %v164_v31 = vpop.f32.mrb[1].mxu1 }
  0xdd   :  { %v112_v32 = vadd.f32 %v111_v30, %v32_v24  ;;  %v165_v33 = vadd.f32 %v164_v31, %v40_v25  ;;  %v113_v34 = vpop.f32.mrb[2].mxu0  ;;  %v166_v35 = vpop.f32.mrb[2].mxu1 }
  0xde   :  { %181 = vst [vmem:[%s309_s3] sm:$0xff] %v110_v28  ;;  %183 = vst [vmem:[%s309_s3 + $0x10] sm:$0xff] %v163_v29  ;;  %v114_v36 = vadd.f32 %v113_v34, %v28_v22  ;;  %v167_v37 = vadd.f32 %v166_v35, %v36_v23  ;;  %v115_v38 = vpop.f32.mrb[3].mxu0  ;;  %v168_v39 = vpop.f32.mrb[3].mxu1 }
  0xdf   :  { %182 = vst [vmem:[%s309_s3 + $0x8] sm:$0xff] %v112_v32  ;;  %184 = vst [vmem:[%s309_s3 + $0x18] sm:$0xff] %v165_v33  ;;  %v116_v40 = vadd.f32 %v115_v38, %v32_v24  ;;  %v169_v41 = vadd.f32 %v168_v39, %v40_v25 }
  0xe0   :  { %185 = vst [vmem:[%s309_s3 + $0x20] sm:$0xff] %v114_v36  ;;  %187 = vst [vmem:[%s309_s3 + $0x30] sm:$0xff] %v167_v37 }
  0xe1   :  { %186 = vst [vmem:[%s309_s3 + $0x28] sm:$0xff] %v116_v40  ;;  %188 = vst [vmem:[%s309_s3 + $0x38] sm:$0xff] %v169_v41 }
  0xe3   :  { %v119_v42 = vpop.f32.mrb[4].mxu0  ;;  %v172_v43 = vpop.f32.mrb[4].mxu1 }
  0xe4   :  { %v120_v44 = vadd.f32 %v119_v42, %v28_v22  ;;  %v173_v45 = vadd.f32 %v172_v43, %v36_v23  ;;  %v121_v46 = vpop.f32.mrb[5].mxu0  ;;  %v174_v47 = vpop.f32.mrb[5].mxu1 }
  0xe5   :  { %v122_v48 = vadd.f32 %v121_v46, %v32_v24  ;;  %v175_v49 = vadd.f32 %v174_v47, %v40_v25  ;;  %v123_v50 = vpop.f32.mrb[6].mxu0  ;;  %v176_v51 = vpop.f32.mrb[6].mxu1 }
  0xe6   :  { %189 = vst [vmem:[%s309_s3 + $0x40] sm:$0xff] %v120_v44  ;;  %191 = vst [vmem:[%s309_s3 + $0x50] sm:$0xff] %v173_v45  ;;  %v124_v52 = vadd.f32 %v123_v50, %v28_v22  ;;  %v177_v53 = vadd.f32 %v176_v51, %v36_v23  ;;  %v125_v54 = vpop.f32.mrb[7].mxu0  ;;  %v178_v55 = vpop.f32.mrb[7].mxu1 }
  0xe7   :  { %190 = vst [vmem:[%s309_s3 + $0x48] sm:$0xff] %v122_v48  ;;  %192 = vst [vmem:[%s309_s3 + $0x58] sm:$0xff] %v175_v49  ;;  %v126_v56 = vadd.f32 %v125_v54, %v32_v24  ;;  %v179_v57 = vadd.f32 %v178_v55, %v40_v25 }
  0xe8   :  { %193 = vst [vmem:[%s309_s3 + $0x60] sm:$0xff] %v124_v52  ;;  %195 = vst [vmem:[%s309_s3 + $0x70] sm:$0xff] %v177_v53 }
  0xe9   :  { %194 = vst [vmem:[%s309_s3 + $0x68] sm:$0xff] %v126_v56  ;;  %196 = vst [vmem:[%s309_s3 + $0x78] sm:$0xff] %v179_v57 }

// kernel: lstm_forward.9
= control target key start
LH: loop header
LB: loop body
LE: loop exit
PB: predicated region body
PF: predicated region fallthrough
CT: control target
= control target key end

     0   :  { %vm151_vm0 = vcmask 31744   ;;  %s276_s1 = inlined_call_operand.vmem [shape: bf16[128,4], index: 1, kind: input, shape index: {}]   ;;  %s277_s0 = inlined_call_operand.vmem [shape: bf16[32,128], index: 0, kind: input, shape index: {}]   ;;  %s278_s2 = inlined_call_operand.vmem [shape: f32[1,4], index: 2, kind: input, shape index: {}]   ;;  %s279_s3 = inlined_call_operand.vmem [shape: f32[32,4], index: 3, kind: output, shape index: {}]  }
   0x1   :  { %v201_v0 = vld [vmem:[%s276_s1] sm:$0xff]   ;;  %v202_v1 = vld [vmem:[%s276_s1 + $0x8] sm:$0xff]   ;;  %v203_v2 = vld [vmem:[%s276_s1 + $0x10] sm:$0xff]  }
   0x2   :  { %181 = vmatprep.subr.bf16.mxu0 %v201_v0  ;;  %v204_v3 = vld [vmem:[%s276_s1 + $0x18] sm:$0xff]   ;;  %v209_v4 = vld [vmem:[%s277_s0] sm:$0xff]   ;;  %v206_v6 = vld [vmem:[%s276_s1 + $0x28] sm:$0xff]  }
   0x3   :  { %182 = vmatpush3.bf16.msra.mxu0 %v201_v0  ;;  %197 = vmatprep.mubr.bf16.mxu0 %v209_v4  ;;  %v205_v5 = vld [vmem:[%s276_s1 + $0x20] sm:$0xff]   ;;  %v207_v7 = vld [vmem:[%s276_s1 + $0x30] sm:$0xff]   ;;  %v208_v8 = vld [vmem:[%s276_s1 + $0x38] sm:$0xff]  }
   0x4   :  { %183 = vmatprep.subr.bf16.mxu0 %v202_v1  ;;  %v210_v9 = vld [vmem:[%s277_s0 + $0x8] sm:$0xff]   ;;  %v160_v10 = vld [vmem:[%s278_s2] ss:$0 sm:$0xff] }
   0x7   :  { %184 = vmatpush3.bf16.msra.mxu0 %v202_v1 }
   0x8   :  { %185 = vmatprep.subr.bf16.mxu0 %v203_v2 }
   0xb   :  { %186 = vmatpush3.bf16.msra.mxu0 %v203_v2 }
   0xc   :  { %187 = vmatprep.subr.bf16.mxu0 %v204_v3 }
   0xf   :  { %188 = vmatpush3.bf16.msra.mxu0 %v204_v3 }
  0x10   :  { %189 = vmatprep.subr.bf16.mxu0 %v205_v5 }
  0x13   :  { %190 = vmatpush3.bf16.msra.mxu0 %v205_v5 }
  0x14   :  { %191 = vmatprep.subr.bf16.mxu0 %v206_v6 }
  0x17   :  { %192 = vmatpush3.bf16.msra.mxu0 %v206_v6 }
  0x18   :  { %193 = vmatprep.subr.bf16.mxu0 %v207_v7 }
  0x1b   :  { %194 = vmatpush3.bf16.msra.mxu0 %v207_v7 }
  0x1c   :  { %195 = vmatprep.subr.bf16.mxu0 %v208_v8 }
  0x1f   :  { %196 = vmatpush3.bf16.msra.mxu0 %v208_v8 }
  0x22   :  { %198 = vmatmul.mubr.bf16.vlgmr.msra.gmra.mrb[0].mxu0 %v210_v9 }
  0xf5   :  { %v199_v11 = vpop.f32.mrb[0].mxu0 }
  0xf6   :  { %v145_v12 = vadd.f32 %v199_v11, %v160_v10  ;;  %v136_v13 = vpop.f32.mrb[1].mxu0 }
  0xf7   :  { %v137_v14 = vadd.f32 %v160_v10, %v136_v13  ;;  %v200_v15 = vpop.f32.mrb[2].mxu0 }
  0xf8   :  { %154 = vst.msk [vmem:[%s279_s3 + $0x10] sm:$0xff] %vm151_vm0, %v145_v12  ;;  %v148_v16 = vadd.f32 %v200_v15, %v160_v10  ;;  %v139_v17 = vpop.f32.mrb[3].mxu0 }
  0xf9   :  { %152 = vst.msk [vmem:[%s279_s3] sm:$0xff] %vm151_vm0, %v137_v14  ;;  %v140_v18 = vadd.f32 %v160_v10, %v139_v17 }
  0xfa   :  { %155 = vst.msk [vmem:[%s279_s3 + $0x18] sm:$0xff] %vm151_vm0, %v148_v16 }
  0xfb   :  { %153 = vst.msk [vmem:[%s279_s3 + $0x8] sm:$0xff] %vm151_vm0, %v140_v18 }

// kernel: lstm_forward.7
= control target key start
LH: loop header
LB: loop body
LE: loop exit
PB: predicated region body
PF: predicated region fallthrough
CT: control target
= control target key end

     0   :  { %v456_v1 = vmov 0   ;;  %v53_v35 = vlaneseq  ;;  %s634_s1 = inlined_call_operand.vmem [shape: bf16[128,512], index: 1, kind: input, shape index: {}]   ;;  %s635_s0 = inlined_call_operand.vmem [shape: bf16[32,128], index: 0, kind: input, shape index: {}]   ;;  %s636_s2 = inlined_call_operand.vmem [shape: f32[1,512], index: 2, kind: input, shape index: {}]   ;;  %s637_s3 = inlined_call_operand.vmem [shape: f32[32,512], index: 3, kind: output, shape index: {}]  }
   0x1   :  { %v406_v0 = vld [vmem:[%s634_s1 + $0x4] ss:$16 sps:$4 sm:$0xff]   ;;  %277 = vmatprep.mubr.bf16.mxu0 %v456_v1  ;;  %330 = vmatprep.mubr.bf16.mxu1 %v456_v1  ;;  %v408_v2 = vld [vmem:[%s634_s1 + $0xc] ss:$16 sps:$4 sm:$0xff]   ;;  %v410_v3 = vld [vmem:[%s634_s1] ss:$16 sps:$4 sm:$0xff]  }
   0x2   :  { %245 = vmatprep.subr.bf16.mxu0 %v406_v0  ;;  %v411_v4 = vld [vmem:[%s634_s1 + $0x8] ss:$16 sps:$4 sm:$0xff]   ;;  %298 = vmatprep.subr.bf16.mxu1 %v408_v2  ;;  %v412_v5 = vld [vmem:[%s634_s1 + $0x24] ss:$16 sps:$4 sm:$0xff]   ;;  %v414_v6 = vld [vmem:[%s634_s1 + $0x2c] ss:$16 sps:$4 sm:$0xff]  }
   0x3   :  { %246 = vmatpush1.bf16.msra.mxu0 %v410_v3  ;;  %299 = vmatpush1.bf16.msra.mxu1 %v411_v4  ;;  %v416_v7 = vld [vmem:[%s634_s1 + $0x20] ss:$16 sps:$4 sm:$0xff]   ;;  %v417_v8 = vld [vmem:[%s634_s1 + $0x28] ss:$16 sps:$4 sm:$0xff]   ;;  %v418_v9 = vld [vmem:[%s634_s1 + $0x44] ss:$16 sps:$4 sm:$0xff]  }
   0x4   :  { %247 = vmatprep.subr.bf16.mxu0 %v412_v5  ;;  %300 = vmatprep.subr.bf16.mxu1 %v414_v6  ;;  %v420_v10 = vld [vmem:[%s634_s1 + $0x4c] ss:$16 sps:$4 sm:$0xff]   ;;  %v422_v11 = vld [vmem:[%s634_s1 + $0x40] ss:$16 sps:$4 sm:$0xff]   ;;  %v423_v12 = vld [vmem:[%s634_s1 + $0x48] ss:$16 sps:$4 sm:$0xff]  }
   0x5   :  { %v424_v13 = vld [vmem:[%s634_s1 + $0x64] ss:$16 sps:$4 sm:$0xff]   ;;  %v426_v14 = vld [vmem:[%s634_s1 + $0x6c] ss:$16 sps:$4 sm:$0xff]   ;;  %v428_v15 = vld [vmem:[%s634_s1 + $0x60] ss:$16 sps:$4 sm:$0xff]  }
   0x6   :  { %v429_v16 = vld [vmem:[%s634_s1 + $0x68] ss:$16 sps:$4 sm:$0xff]   ;;  %v430_v17 = vld [vmem:[%s634_s1 + $0x84] ss:$16 sps:$4 sm:$0xff]   ;;  %v432_v18 = vld [vmem:[%s634_s1 + $0x8c] ss:$16 sps:$4 sm:$0xff]  }
   0x7   :  { %248 = vmatpush1.bf16.msra.mxu0 %v416_v7  ;;  %301 = vmatpush1.bf16.msra.mxu1 %v417_v8  ;;  %v434_v19 = vld [vmem:[%s634_s1 + $0x80] ss:$16 sps:$4 sm:$0xff]   ;;  %v435_v20 = vld [vmem:[%s634_s1 + $0x88] ss:$16 sps:$4 sm:$0xff]   ;;  %v436_v21 = vld [vmem:[%s634_s1 + $0xa4] ss:$16 sps:$4 sm:$0xff]  }
   0x8   :  { %249 = vmatprep.subr.bf16.mxu0 %v418_v9  ;;  %302 = vmatprep.subr.bf16.mxu1 %v420_v10  ;;  %v438_v22 = vld [vmem:[%s634_s1 + $0xac] ss:$16 sps:$4 sm:$0xff]   ;;  %v440_v23 = vld [vmem:[%s634_s1 + $0xa0] ss:$16 sps:$4 sm:$0xff]   ;;  %v441_v24 = vld [vmem:[%s634_s1 + $0xa8] ss:$16 sps:$4 sm:$0xff]  }
   0x9   :  { %v442_v25 = vld [vmem:[%s634_s1 + $0xc4] ss:$16 sps:$4 sm:$0xff]   ;;  %v444_v26 = vld [vmem:[%s634_s1 + $0xcc] ss:$16 sps:$4 sm:$0xff]   ;;  %v446_v27 = vld [vmem:[%s634_s1 + $0xc0] ss:$16 sps:$4 sm:$0xff]  }
   0xa   :  { %v447_v28 = vld [vmem:[%s634_s1 + $0xc8] ss:$16 sps:$4 sm:$0xff]   ;;  %v448_v29 = vld [vmem:[%s634_s1 + $0xe4] ss:$16 sps:$4 sm:$0xff]   ;;  %v450_v30 = vld [vmem:[%s634_s1 + $0xec] ss:$16 sps:$4 sm:$0xff]  }
   0xb   :  { %250 = vmatpush1.bf16.msra.mxu0 %v422_v11  ;;  %303 = vmatpush1.bf16.msra.mxu1 %v423_v12  ;;  %v452_v31 = vld [vmem:[%s634_s1 + $0xe0] ss:$16 sps:$4 sm:$0xff]   ;;  %v453_v32 = vld [vmem:[%s634_s1 + $0xe8] ss:$16 sps:$4 sm:$0xff]   ;;  %v54_v36 = vshrl.u32 %v53_v35, 7 }
   0xc   :  { %251 = vmatprep.subr.bf16.mxu0 %v424_v13  ;;  %304 = vmatprep.subr.bf16.mxu1 %v426_v14  ;;  %v454_v33 = vld [vmem:[%s635_s0] sm:$0xff]   ;;  %v455_v34 = vld [vmem:[%s635_s0 + $0x8] sm:$0xff]  }
   0xd   :  { %v55_v37 = vsub.s32 0, %v54_v36  ;;  %v63_v38 = vsub.s32 2, %v54_v36  ;;  %v51_v39 = vld [vmem:[%s636_s2] sm:$0xf]  ;;  %v59_v40 = vsub.s32 1, %v54_v36  ;;  %v67_v41 = vsub.s32 3, %v54_v36 }
   0xf   :  { %252 = vmatpush1.bf16.msra.mxu0 %v428_v15  ;;  %305 = vmatpush1.bf16.msra.mxu1 %v429_v16  ;;  %v56_v42 = vrot.slane %v51_v39, %v55_v37  ;;  %v64_v43 = vrot.slane %v51_v39, %v63_v38  ;;  %v60_v44 = vrot.slane %v51_v39, %v59_v40 }
  0x10   :  { %253 = vmatprep.subr.bf16.mxu0 %v430_v17  ;;  %306 = vmatprep.subr.bf16.mxu1 %v432_v18  ;;  %v68_v45 = vrot.slane %v51_v39, %v67_v41 }
  0x13   :  { %254 = vmatpush1.bf16.msra.mxu0 %v434_v19  ;;  %307 = vmatpush1.bf16.msra.mxu1 %v435_v20 }
  0x14   :  { %255 = vmatprep.subr.bf16.mxu0 %v436_v21  ;;  %308 = vmatprep.subr.bf16.mxu1 %v438_v22 }
  0x17   :  { %256 = vmatpush1.bf16.msra.mxu0 %v440_v23  ;;  %309 = vmatpush1.bf16.msra.mxu1 %v441_v24 }
  0x18   :  { %257 = vmatprep.subr.bf16.mxu0 %v442_v25  ;;  %310 = vmatprep.subr.bf16.mxu1 %v444_v26 }
  0x1b   :  { %258 = vmatpush1.bf16.msra.mxu0 %v446_v27  ;;  %311 = vmatpush1.bf16.msra.mxu1 %v447_v28 }
  0x1c   :  { %259 = vmatprep.subr.bf16.mxu0 %v448_v29  ;;  %312 = vmatprep.subr.bf16.mxu1 %v450_v30 }
  0x1f   :  { %260 = vmatpush1.bf16.msra.mxu0 %v452_v31  ;;  %313 = vmatpush1.bf16.msra.mxu1 %v453_v32 }
  0x22   :  { %278 = vmatmul.mubr.bf16.vlgmr.msra.gmra.mrb[0].mxu0 %v454_v33  ;;  %331 = vmatmul.mubr.bf16.vlgmr.msra.gmra.mrb[0].mxu1 %v454_v33 }
  0x23   :  { %287 = vmatprep.mubr.bf16.mxu0 %v456_v1  ;;  %340 = vmatprep.mubr.bf16.mxu1 %v456_v1 }
  0x2a   :  { %288 = vmatmul.mubr.bf16.gmra.mrb[4].mxu0 %v455_v34  ;;  %341 = vmatmul.mubr.bf16.gmra.mrb[4].mxu1 %v455_v34 }
  0xf5   :  { %v279_v46 = vpop.f32.mrb[0].mxu0  ;;  %v332_v47 = vpop.f32.mrb[0].mxu1 }
  0xf6   :  { %v280_v48 = vadd.f32 %v279_v46, %v56_v42  ;;  %v333_v49 = vadd.f32 %v332_v47, %v64_v43  ;;  %v281_v50 = vpop.f32.mrb[1].mxu0  ;;  %v334_v51 = vpop.f32.mrb[1].mxu1 }
  0xf7   :  { %v282_v52 = vadd.f32 %v281_v50, %v60_v44  ;;  %v335_v53 = vadd.f32 %v334_v51, %v68_v45  ;;  %v283_v54 = vpop.f32.mrb[2].mxu0  ;;  %v336_v55 = vpop.f32.mrb[2].mxu1 }
  0xf8   :  { %351 = vst [vmem:[%s637_s3] sm:$0xff] %v280_v48  ;;  %353 = vst [vmem:[%s637_s3 + $0x10] sm:$0xff] %v333_v49  ;;  %v284_v56 = vadd.f32 %v283_v54, %v56_v42  ;;  %v337_v57 = vadd.f32 %v336_v55, %v64_v43  ;;  %v285_v58 = vpop.f32.mrb[3].mxu0  ;;  %v338_v59 = vpop.f32.mrb[3].mxu1 }
  0xf9   :  { %352 = vst [vmem:[%s637_s3 + $0x8] sm:$0xff] %v282_v52  ;;  %354 = vst [vmem:[%s637_s3 + $0x18] sm:$0xff] %v335_v53  ;;  %v286_v60 = vadd.f32 %v285_v58, %v60_v44  ;;  %v339_v61 = vadd.f32 %v338_v59, %v68_v45 }
  0xfa   :  { %355 = vst [vmem:[%s637_s3 + $0x20] sm:$0xff] %v284_v56  ;;  %357 = vst [vmem:[%s637_s3 + $0x30] sm:$0xff] %v337_v57 }
  0xfb   :  { %356 = vst [vmem:[%s637_s3 + $0x28] sm:$0xff] %v286_v60  ;;  %358 = vst [vmem:[%s637_s3 + $0x38] sm:$0xff] %v339_v61 }
  0xfd   :  { %v289_v62 = vpop.f32.mrb[4].mxu0  ;;  %v342_v63 = vpop.f32.mrb[4].mxu1 }
  0xfe   :  { %v290_v0 = vadd.f32 %v289_v62, %v56_v42  ;;  %v343_v1 = vadd.f32 %v342_v63, %v64_v43  ;;  %v291_v2 = vpop.f32.mrb[5].mxu0  ;;  %v344_v3 = vpop.f32.mrb[5].mxu1 }
  0xff   :  { %v292_v4 = vadd.f32 %v291_v2, %v60_v44  ;;  %v345_v5 = vadd.f32 %v344_v3, %v68_v45  ;;  %v293_v6 = vpop.f32.mrb[6].mxu0  ;;  %v346_v7 = vpop.f32.mrb[6].mxu1 }
 0x100   :  { %359 = vst [vmem:[%s637_s3 + $0x40] sm:$0xff] %v290_v0  ;;  %361 = vst [vmem:[%s637_s3 + $0x50] sm:$0xff] %v343_v1  ;;  %v294_v8 = vadd.f32 %v293_v6, %v56_v42  ;;  %v347_v9 = vadd.f32 %v346_v7, %v64_v43  ;;  %v295_v10 = vpop.f32.mrb[7].mxu0  ;;  %v348_v11 = vpop.f32.mrb[7].mxu1 }
 0x101   :  { %360 = vst [vmem:[%s637_s3 + $0x48] sm:$0xff] %v292_v4  ;;  %362 = vst [vmem:[%s637_s3 + $0x58] sm:$0xff] %v345_v5  ;;  %v296_v12 = vadd.f32 %v295_v10, %v60_v44  ;;  %v349_v13 = vadd.f32 %v348_v11, %v68_v45 }
 0x102   :  { %363 = vst [vmem:[%s637_s3 + $0x60] sm:$0xff] %v294_v8  ;;  %365 = vst [vmem:[%s637_s3 + $0x70] sm:$0xff] %v347_v9 }
 0x103   :  { %364 = vst [vmem:[%s637_s3 + $0x68] sm:$0xff] %v296_v12  ;;  %366 = vst [vmem:[%s637_s3 + $0x78] sm:$0xff] %v349_v13 }

// kernel: lstm_forward.6
= control target key start
LH: loop header
LB: loop body
LE: loop exit
PB: predicated region body
PF: predicated region fallthrough
CT: control target
= control target key end

     0   :  { %s2482_s0 = inlined_call_operand.vmem [shape: f32[8,4,512], index: 0, kind: input, shape index: {}]   ;;  %s2483_s1 = inlined_call_operand.vmem [shape: bf16[128,512], index: 1, kind: input, shape index: {}]   ;;  %s2484_s2 = inlined_call_operand.vmem [shape: bf16[8,4,128], index: 2, kind: output, shape index: {}]  }
   0x1   :  { %v31_v0 = vld [vmem:[%s2483_s1] sm:$0xf]  ;;  %v33_v1 = vld [vmem:[%s2483_s1 + $0x10] sm:$0xf]  ;;  %v35_v2 = vld [vmem:[%s2483_s1 + $0x4] sm:$0xf] }
   0x2   :  { %32 = vst [vmem:[#allocation4] sm:$0xf] %v31_v0  ;;  %34 = vst [vmem:[#allocation4 + $0x4] sm:$0xf] %v33_v1  ;;  %v37_v3 = vld [vmem:[%s2483_s1 + $0x14] sm:$0xf] }
   0x3   :  { %36 = vst [vmem:[#allocation4 + $0x8] sm:$0xf] %v35_v2  ;;  %v39_v4 = vld [vmem:[%s2483_s1 + $0x8] sm:$0xf]  ;;  %v41_v5 = vld [vmem:[%s2483_s1 + $0x18] sm:$0xf] }
   0x4   :  { %38 = vst [vmem:[#allocation4 + $0xc] sm:$0xf] %v37_v3  ;;  %40 = vst [vmem:[#allocation4 + $0x10] sm:$0xf] %v39_v4  ;;  %v43_v6 = vld [vmem:[%s2483_s1 + $0xc] sm:$0xf] }
   0x5   :  { %42 = vst [vmem:[#allocation4 + $0x14] sm:$0xf] %v41_v5  ;;  %v45_v7 = vld [vmem:[%s2483_s1 + $0x1c] sm:$0xff]   ;;  %v49_v8 = vld [vmem:[%s2483_s1 + $0x30] sm:$0xf] }
   0x6   :  { %44 = vst [vmem:[#allocation4 + $0x18] sm:$0xf] %v43_v6  ;;  %46 = vst [vmem:[#allocation4 + $0x1c] sm:$0xff] %v45_v7   ;;  %v51_v9 = vld [vmem:[%s2483_s1 + $0x24] sm:$0xf]  ;;  %v61_v14 = vld [vmem:[%s2483_s1 + $0x3c] sm:$0xff]  }
   0x7   :  { %50 = vst [vmem:[#allocation4 + $0x24] sm:$0xf] %v49_v8  ;;  %v53_v10 = vld [vmem:[%s2483_s1 + $0x34] sm:$0xf]  ;;  %v55_v11 = vld [vmem:[%s2483_s1 + $0x28] sm:$0xf] }
   0x8   :  { %52 = vst [vmem:[#allocation4 + $0x28] sm:$0xf] %v51_v9  ;;  %54 = vst [vmem:[#allocation4 + $0x2c] sm:$0xf] %v53_v10  ;;  %v57_v12 = vld [vmem:[%s2483_s1 + $0x38] sm:$0xf] }
   0x9   :  { %56 = vst [vmem:[#allocation4 + $0x30] sm:$0xf] %v55_v11  ;;  %v59_v13 = vld [vmem:[%s2483_s1 + $0x2c] sm:$0xf]  ;;  %58 = vst [vmem:[#allocation4 + $0x34] sm:$0xf] %v57_v12 }
   0xa   :  { %60 = vst [vmem:[#allocation4 + $0x38] sm:$0xf] %v59_v13  ;;  %62 = vst [vmem:[#allocation4 + $0x3c] sm:$0xff] %v61_v14   ;;  %v65_v15 = vld [vmem:[%s2483_s1 + $0x50] sm:$0xf]  ;;  %v77_v21 = vld [vmem:[%s2483_s1 + $0x5c] sm:$0xff]  }
   0xb   :  { %v67_v16 = vld [vmem:[%s2483_s1 + $0x44] sm:$0xf]  ;;  %v69_v17 = vld [vmem:[%s2483_s1 + $0x54] sm:$0xf]  ;;  %66 = vst [vmem:[#allocation4 + $0x44] sm:$0xf] %v65_v15 }
   0xc   :  { %68 = vst [vmem:[#allocation4 + $0x48] sm:$0xf] %v67_v16  ;;  %70 = vst [vmem:[#allocation4 + $0x4c] sm:$0xf] %v69_v17  ;;  %v71_v18 = vld [vmem:[%s2483_s1 + $0x48] sm:$0xf] }
   0xd   :  { %v73_v19 = vld [vmem:[%s2483_s1 + $0x58] sm:$0xf]  ;;  %v75_v20 = vld [vmem:[%s2483_s1 + $0x4c] sm:$0xf]  ;;  %72 = vst [vmem:[#allocation4 + $0x50] sm:$0xf] %v71_v18 }
   0xe   :  { %74 = vst [vmem:[#allocation4 + $0x54] sm:$0xf] %v73_v19  ;;  %76 = vst [vmem:[#allocation4 + $0x58] sm:$0xf] %v75_v20  ;;  %v81_v22 = vld [vmem:[%s2483_s1 + $0x70] sm:$0xf] }
   0xf   :  { %v83_v23 = vld [vmem:[%s2483_s1 + $0x64] sm:$0xf]  ;;  %78 = vst [vmem:[#allocation4 + $0x5c] sm:$0xff] %v77_v21   ;;  %82 = vst [vmem:[#allocation4 + $0x64] sm:$0xf] %v81_v22  ;;  %v93_v28 = vld [vmem:[%s2483_s1 + $0x7c] sm:$0xff]  }
  0x10   :  { %84 = vst [vmem:[#allocation4 + $0x68] sm:$0xf] %v83_v23  ;;  %v85_v24 = vld [vmem:[%s2483_s1 + $0x74] sm:$0xf]  ;;  %v87_v25 = vld [vmem:[%s2483_s1 + $0x68] sm:$0xf] }
  0x11   :  { %v89_v26 = vld [vmem:[%s2483_s1 + $0x78] sm:$0xf]  ;;  %86 = vst [vmem:[#allocation4 + $0x6c] sm:$0xf] %v85_v24  ;;  %88 = vst [vmem:[#allocation4 + $0x70] sm:$0xf] %v87_v25 }
  0x12   :  { %90 = vst [vmem:[#allocation4 + $0x74] sm:$0xf] %v89_v26  ;;  %v91_v27 = vld [vmem:[%s2483_s1 + $0x6c] sm:$0xf]  ;;  %v97_v29 = vld [vmem:[%s2483_s1 + $0x90] sm:$0xf] }
  0x13   :  { %92 = vst [vmem:[#allocation4 + $0x78] sm:$0xf] %v91_v27  ;;  %94 = vst [vmem:[#allocation4 + $0x7c] sm:$0xff] %v93_v28   ;;  %v99_v30 = vld [vmem:[%s2483_s1 + $0x84] sm:$0xf]  ;;  %v109_v35 = vld [vmem:[%s2483_s1 + $0x9c] sm:$0xff]  }
  0x14   :  { %98 = vst [vmem:[#allocation4 + $0x84] sm:$0xf] %v97_v29  ;;  %v101_v31 = vld [vmem:[%s2483_s1 + $0x94] sm:$0xf]  ;;  %v103_v32 = vld [vmem:[%s2483_s1 + $0x88] sm:$0xf] }
  0x15   :  { %100 = vst [vmem:[#allocation4 + $0x88] sm:$0xf] %v99_v30  ;;  %102 = vst [vmem:[#allocation4 + $0x8c] sm:$0xf] %v101_v31  ;;  %v105_v33 = vld [vmem:[%s2483_s1 + $0x98] sm:$0xf] }
  0x16   :  { %104 = vst [vmem:[#allocation4 + $0x90] sm:$0xf] %v103_v32  ;;  %v107_v34 = vld [vmem:[%s2483_s1 + $0x8c] sm:$0xf]  ;;  %106 = vst [vmem:[#allocation4 + $0x94] sm:$0xf] %v105_v33 }
  0x17   :  { %108 = vst [vmem:[#allocation4 + $0x98] sm:$0xf] %v107_v34  ;;  %110 = vst [vmem:[#allocation4 + $0x9c] sm:$0xff] %v109_v35   ;;  %v113_v36 = vld [vmem:[%s2483_s1 + $0xb0] sm:$0xf]  ;;  %v125_v42 = vld [vmem:[%s2483_s1 + $0xbc] sm:$0xff]  }
  0x18   :  { %v115_v37 = vld [vmem:[%s2483_s1 + $0xa4] sm:$0xf]  ;;  %v117_v38 = vld [vmem:[%s2483_s1 + $0xb4] sm:$0xf]  ;;  %114 = vst [vmem:[#allocation4 + $0xa4] sm:$0xf] %v113_v36 }
  0x19   :  { %116 = vst [vmem:[#allocation4 + $0xa8] sm:$0xf] %v115_v37  ;;  %118 = vst [vmem:[#allocation4 + $0xac] sm:$0xf] %v117_v38  ;;  %v119_v39 = vld [vmem:[%s2483_s1 + $0xa8] sm:$0xf] }
  0x1a   :  { %v121_v40 = vld [vmem:[%s2483_s1 + $0xb8] sm:$0xf]  ;;  %v123_v41 = vld [vmem:[%s2483_s1 + $0xac] sm:$0xf]  ;;  %120 = vst [vmem:[#allocation4 + $0xb0] sm:$0xf] %v119_v39 }
  0x1b   :  { %122 = vst [vmem:[#allocation4 + $0xb4] sm:$0xf] %v121_v40  ;;  %124 = vst [vmem:[#allocation4 + $0xb8] sm:$0xf] %v123_v41  ;;  %v129_v43 = vld [vmem:[%s2483_s1 + $0xd0] sm:$0xf] }
  0x1c   :  { %v131_v44 = vld [vmem:[%s2483_s1 + $0xc4] sm:$0xf]  ;;  %126 = vst [vmem:[#allocation4 + $0xbc] sm:$0xff] %v125_v42   ;;  %130 = vst [vmem:[#allocation4 + $0xc4] sm:$0xf] %v129_v43  ;;  %v141_v49 = vld [vmem:[%s2483_s1 + $0xdc] sm:$0xff]  }
  0x1d   :  { %132 = vst [vmem:[#allocation4 + $0xc8] sm:$0xf] %v131_v44  ;;  %v133_v45 = vld [vmem:[%s2483_s1 + $0xd4] sm:$0xf]  ;;  %v135_v46 = vld [vmem:[%s2483_s1 + $0xc8] sm:$0xf] }
  0x1e   :  { %v137_v47 = vld [vmem:[%s2483_s1 + $0xd8] sm:$0xf]  ;;  %134 = vst [vmem:[#allocation4 + $0xcc] sm:$0xf] %v133_v45  ;;  %136 = vst [vmem:[#allocation4 + $0xd0] sm:$0xf] %v135_v46 }
  0x1f   :  { %138 = vst [vmem:[#allocation4 + $0xd4] sm:$0xf] %v137_v47  ;;  %v139_v48 = vld [vmem:[%s2483_s1 + $0xcc] sm:$0xf]  ;;  %v145_v50 = vld [vmem:[%s2483_s1 + $0xf0] sm:$0xf] }
  0x20   :  { %140 = vst [vmem:[#allocation4 + $0xd8] sm:$0xf] %v139_v48  ;;  %142 = vst [vmem:[#allocation4 + $0xdc] sm:$0xff] %v141_v49   ;;  %v147_v51 = vld [vmem:[%s2483_s1 + $0xe4] sm:$0xf] }
  0x21   :  { %146 = vst [vmem:[#allocation4 + $0xe4] sm:$0xf] %v145_v50  ;;  %v149_v52 = vld [vmem:[%s2483_s1 + $0xf4] sm:$0xf]  ;;  %v151_v53 = vld [vmem:[%s2483_s1 + $0xe8] sm:$0xf] }
  0x22   :  { %148 = vst [vmem:[#allocation4 + $0xe8] sm:$0xf] %v147_v51  ;;  %150 = vst [vmem:[#allocation4 + $0xec] sm:$0xf] %v149_v52  ;;  %v153_v54 = vld [vmem:[%s2483_s1 + $0xf8] sm:$0xf] }
  0x23   :  { %152 = vst [vmem:[#allocation4 + $0xf0] sm:$0xf] %v151_v53  ;;  %v155_v55 = vld [vmem:[%s2483_s1 + $0xec] sm:$0xf]  ;;  %v157_v56 = vld [vmem:[%s2483_s1 + $0xfc] sm:$0xf] }
  0x24   :  { %154 = vst [vmem:[#allocation4 + $0xf4] sm:$0xf] %v153_v54  ;;  %156 = vst [vmem:[#allocation4 + $0xf8] sm:$0xf] %v155_v55 }
  0x25   :  { %158 = vst [vmem:[#allocation4 + $0xfc] sm:$0xf] %v157_v56 }
  0x26   :  { %317 = vsyncadd [#allocation5], 4096 }
  0x27   :  { %1800 = dma.done.wait [#allocation5], 4096 }
  0x28   :  { %1801 = vsyncadd [#allocation5], 4294963200  ;;  %v1990_v57 = vld [vmem:[#allocation4 + $0x8] sm:$0xff]  ;;  %v1992_v58 = vld [vmem:[#allocation4] sm:$0xff]  ;;  %v1802_v60 = vmov 0   ;;  %v1803_v61 = vmov 0.0  }
  0x29   :  { %v1994_v59 = vld [vmem:[#allocation4 + $0x28] sm:$0xff]  ;;  %361 = vmatprep.subr.bf16.mxu0 %v1990_v57  ;;  %393 = vmatprep.mubr.bf16.mxu0 %v1802_v60  ;;  %322 = vst [vmem:[#allocation2] sm:$0xf] %v1803_v61  ;;  %323 = vst [vmem:[#allocation3] sm:$0xf] %v1803_v61  ;;  %v1999_v62 = vld [vmem:[#allocation4 + $0x18] sm:$0xff] }
  0x2a   :  { %362 = vmatpush1.bf16.msra.mxu0 %v1992_v58  ;;  %434 = vmatprep.mubr.bf16.mxu1 %v1802_v60  ;;  %v2003_v63 = vld [vmem:[#allocation4 + $0x20] sm:$0xff]  ;;  %v2006_v0 = vld [vmem:[#allocation4 + $0x10] sm:$0xff]  ;;  %v2008_v1 = vld [vmem:[#allocation4 + $0x38] sm:$0xff] }
  0x2b   :  { %363 = vmatprep.subr.bf16.mxu0 %v1994_v59  ;;  %402 = vmatprep.subr.bf16.mxu1 %v1999_v62  ;;  %v2010_v2 = vld [vmem:[#allocation4 + $0x48] sm:$0xff]  ;;  %v2014_v3 = vld [vmem:[#allocation4 + $0x30] sm:$0xff]  ;;  %v2017_v4 = vld [vmem:[#allocation4 + $0x58] sm:$0xff] }
  0x2c   :  { %403 = vmatpush1.bf16.msra.mxu1 %v2006_v0  ;;  %v2020_v5 = vld [vmem:[#allocation4 + $0x40] sm:$0xff]  ;;  %v2022_v6 = vld [vmem:[#allocation4 + $0x68] sm:$0xff]  ;;  %v2026_v7 = vld [vmem:[#allocation4 + $0x50] sm:$0xff] }
  0x2d   :  { %404 = vmatprep.subr.bf16.mxu1 %v2008_v1  ;;  %v2029_v8 = vld [vmem:[#allocation4 + $0x78] sm:$0xff]  ;;  %v2032_v9 = vld [vmem:[#allocation4 + $0x60] sm:$0xff]  ;;  %v2034_v10 = vld [vmem:[#allocation4 + $0x88] sm:$0xff] }
  0x2e   :  { %364 = vmatpush1.bf16.msra.mxu0 %v2003_v63  ;;  %v2038_v11 = vld [vmem:[#allocation4 + $0x70] sm:$0xff]  ;;  %v2041_v12 = vld [vmem:[#allocation4 + $0x98] sm:$0xff]  ;;  %v2044_v13 = vld [vmem:[#allocation4 + $0x80] sm:$0xff] }
  0x2f   :  { %365 = vmatprep.subr.bf16.mxu0 %v2010_v2  ;;  %v2046_v14 = vld [vmem:[#allocation4 + $0xa8] sm:$0xff]  ;;  %v2050_v15 = vld [vmem:[#allocation4 + $0x90] sm:$0xff]  ;;  %v2053_v16 = vld [vmem:[#allocation4 + $0xb8] sm:$0xff] }
  0x30   :  { %405 = vmatpush1.bf16.msra.mxu1 %v2014_v3  ;;  %v2056_v17 = vld [vmem:[#allocation4 + $0xa0] sm:$0xff]  ;;  %v2058_v18 = vld [vmem:[#allocation4 + $0xc8] sm:$0xff]  ;;  %v2062_v19 = vld [vmem:[#allocation4 + $0xb0] sm:$0xff] }
  0x31   :  { %406 = vmatprep.subr.bf16.mxu1 %v2017_v4  ;;  %v2065_v20 = vld [vmem:[#allocation4 + $0xd8] sm:$0xff]  ;;  %v2068_v21 = vld [vmem:[#allocation4 + $0xc0] sm:$0xff]  ;;  %v2070_v22 = vld [vmem:[#allocation4 + $0xe8] sm:$0xff] }
  0x32   :  { %366 = vmatpush1.bf16.msra.mxu0 %v2020_v5  ;;  %v2074_v23 = vld [vmem:[#allocation4 + $0xd0] sm:$0xff]  ;;  %v324_v24 = vld [vmem:[#allocation2] sm:$0xf]  ;;  %v2080_v26 = vld [vmem:[#allocation4 + $0xe0] sm:$0xff] }
  0x33   :  { %367 = vmatprep.subr.bf16.mxu0 %v2022_v6  ;;  %v2077_v25 = vld [vmem:[#allocation4 + $0xf8] sm:$0xff]  ;;  %v328_v27 = vpack.c.bf16 %v324_v24, %v324_v24  ;;  %v2084_v28 = vld [vmem:[#allocation4 + $0xf0] sm:$0xff]  ;;  %v327_v38 = vld [vmem:[%s2482_s0 + $0x8] sm:$0xff] }
  0x34   :  { %407 = vmatpush1.bf16.msra.mxu1 %v2026_v7  ;;  %v326_v30 = vld [vmem:[%s2482_s0] sm:$0xff] }
  0x35   :  { %408 = vmatprep.subr.bf16.mxu1 %v2029_v8  ;;  %v325_v55 = vld [vmem:[#allocation3] sm:$0xf] }
  0x36   :  { %368 = vmatpush1.bf16.msra.mxu0 %v2032_v9 }
  0x37   :  { %369 = vmatprep.subr.bf16.mxu0 %v2034_v10 }
  0x38   :  { %409 = vmatpush1.bf16.msra.mxu1 %v2038_v11 }
  0x39   :  { %410 = vmatprep.subr.bf16.mxu1 %v2041_v12 }
  0x3a   :  { %370 = vmatpush1.bf16.msra.mxu0 %v2044_v13 }
  0x3b   :  { %371 = vmatprep.subr.bf16.mxu0 %v2046_v14 }
  0x3c   :  { %411 = vmatpush1.bf16.msra.mxu1 %v2050_v15 }
  0x3d   :  { %412 = vmatprep.subr.bf16.mxu1 %v2053_v16 }
  0x3e   :  { %372 = vmatpush1.bf16.msra.mxu0 %v2056_v17 }
  0x3f   :  { %373 = vmatprep.subr.bf16.mxu0 %v2058_v18 }
  0x40   :  { %413 = vmatpush1.bf16.msra.mxu1 %v2062_v19 }
  0x41   :  { %414 = vmatprep.subr.bf16.mxu1 %v2065_v20 }
  0x42   :  { %374 = vmatpush1.bf16.msra.mxu0 %v2068_v21 }
  0x43   :  { %375 = vmatprep.subr.bf16.mxu0 %v2070_v22 }
  0x44   :  { %415 = vmatpush1.bf16.msra.mxu1 %v2074_v23 }
  0x45   :  { %416 = vmatprep.subr.bf16.mxu1 %v2077_v25 }
  0x46   :  { %376 = vmatpush1.bf16.msra.mxu0 %v2080_v26 }
  0x47   :  { %520 = vmatprep.subr.bf16.mxu0 %v1990_v57 }
  0x48   :  { %417 = vmatpush1.bf16.msra.mxu1 %v2084_v28 }
  0x49   :  { %394 = vmatmul.mubr.bf16.vlgmr.msra.gmra.mrb[0].mxu0 %v328_v27  ;;  %561 = vmatprep.subr.bf16.mxu1 %v1999_v62 }
  0x4a   :  { %521 = vmatpush1.bf16.msra.mxu0 %v1992_v58  ;;  %552 = vmatprep.mubr.bf16.mxu0 %v1802_v60 }
  0x4b   :  { %435 = vmatmul.mubr.bf16.vlgmr.msra.gmra.mrb[0].mxu1 %v328_v27  ;;  %522 = vmatprep.subr.bf16.mxu0 %v1994_v59 }
  0x4c   :  { %562 = vmatpush1.bf16.msra.mxu1 %v2006_v0  ;;  %593 = vmatprep.mubr.bf16.mxu1 %v1802_v60 }
  0x4d   :  { %563 = vmatprep.subr.bf16.mxu1 %v2008_v1 }
  0x4e   :  { %523 = vmatpush1.bf16.msra.mxu0 %v2003_v63 }
  0x4f   :  { %524 = vmatprep.subr.bf16.mxu0 %v2010_v2 }
  0x50   :  { %564 = vmatpush1.bf16.msra.mxu1 %v2014_v3 }
  0x51   :  { %565 = vmatprep.subr.bf16.mxu1 %v2017_v4 }
  0x52   :  { %525 = vmatpush1.bf16.msra.mxu0 %v2020_v5 }
  0x53   :  { %526 = vmatprep.subr.bf16.mxu0 %v2022_v6 }
  0x54   :  { %566 = vmatpush1.bf16.msra.mxu1 %v2026_v7 }
  0x55   :  { %567 = vmatprep.subr.bf16.mxu1 %v2029_v8 }
  0x56   :  { %527 = vmatpush1.bf16.msra.mxu0 %v2032_v9 }
  0x57   :  { %528 = vmatprep.subr.bf16.mxu0 %v2034_v10 }
  0x58   :  { %568 = vmatpush1.bf16.msra.mxu1 %v2038_v11 }
  0x59   :  { %569 = vmatprep.subr.bf16.mxu1 %v2041_v12 }
  0x5a   :  { %529 = vmatpush1.bf16.msra.mxu0 %v2044_v13 }
  0x5b   :  { %530 = vmatprep.subr.bf16.mxu0 %v2046_v14 }
  0x5c   :  { %570 = vmatpush1.bf16.msra.mxu1 %v2050_v15 }
  0x5d   :  { %571 = vmatprep.subr.bf16.mxu1 %v2053_v16 }
  0x5e   :  { %531 = vmatpush1.bf16.msra.mxu0 %v2056_v17 }
  0x5f   :  { %532 = vmatprep.subr.bf16.mxu0 %v2058_v18 }
  0x60   :  { %572 = vmatpush1.bf16.msra.mxu1 %v2062_v19 }
  0x61   :  { %573 = vmatprep.subr.bf16.mxu1 %v2065_v20 }
  0x62   :  { %533 = vmatpush1.bf16.msra.mxu0 %v2068_v21 }
  0x63   :  { %534 = vmatprep.subr.bf16.mxu0 %v2070_v22 }
  0x64   :  { %574 = vmatpush1.bf16.msra.mxu1 %v2074_v23 }
  0x65   :  { %575 = vmatprep.subr.bf16.mxu1 %v2077_v25 }
  0x66   :  { %535 = vmatpush1.bf16.msra.mxu0 %v2080_v26 }
  0x67   :  { %680 = vmatprep.subr.bf16.mxu0 %v1990_v57 }
  0x68   :  { %576 = vmatpush1.bf16.msra.mxu1 %v2084_v28 }
  0x69   :  { %721 = vmatprep.subr.bf16.mxu1 %v1999_v62 }
 0x11c   :  { %v395_v29 = vpop.f32.mrb[0].mxu0 }
 0x11d   :  { %v397_v31 = vpop.f32.mrb[1].mxu0 }
 0x11e   :  { %v447_v32 = vcombine.low %v395_v29, %v397_v31  ;;  %v399_v33 = vpop.f32.mrb[2].mxu0  ;;  %v436_v34 = vpop.f32.mrb[0].mxu1 }
 0x11f   :  { %v400_v35 = vpop.f32.mrb[3].mxu0  ;;  %v438_v36 = vpop.f32.mrb[1].mxu1 }
 0x120   :  { %v451_v37 = vadd.f32 %v447_v32, %v326_v30  ;;  %v448_v39 = vcombine.low %v436_v34, %v438_v36  ;;  %v440_v40 = vpop.f32.mrb[2].mxu1  ;;  %v1628_v36 = vld [vmem:[%s2482_s0 + $0x10] sm:$0xff] }
 0x121   :  { %v441_v41 = vpop.f32.mrb[3].mxu1 }
 0x122   :  { %v1625_v42 = vmul.f32 -1.442695, %v451_v37  ;;  %v460_v43 = vrot.slane %v451_v37, 4  ;;  %v452_v44 = vadd.f32 %v448_v39, %v327_v38 }
 0x124   :  { %1672 = vpow2.f32 %v1625_v42  ;;  %v1626_v45 = vmul.f32 -1.442695, %v460_v43  ;;  %v470_v46 = vrot.slane %v452_v44, 4 }
 0x126   :  { %1674 = vpow2.f32 %v1626_v45  ;;  %v1627_v47 = vmul.f32 -1.442695, %v470_v46  ;;  %v1629_v46 = vld [vmem:[%s2482_s0 + $0x18] sm:$0xff] }
 0x127   :  { %1676 = vtanh.f32 %v452_v44 }
 0x128   :  { %1678 = vpow2.f32 %v1627_v47 }
 0x12e   :  { %v1673_v48 = vpop.eup %1672 }
 0x12f   :  { %v456_v49 = vadd.f32 1.0, %v1673_v48 }
 0x130   :  { %v1675_v50 = vpop.eup %1674 }
 0x131   :  { %1680 = vrcp.f32 %v456_v49  ;;  %v465_v51 = vadd.f32 1.0, %v1675_v50  ;;  %v1677_v52 = vpop.eup %1676 }
 0x132   :  { %v1679_v53 = vpop.eup %1678 }
 0x133   :  { %1682 = vrcp.f32 %v465_v51  ;;  %v475_v56 = vadd.f32 1.0, %v1679_v53 }
 0x135   :  { %1684 = vrcp.f32 %v475_v56 }
 0x13b   :  { %v1681_v54 = vpop.eup %1680 }
 0x13c   :  { %v479_v61 = vmul.f32 %v1681_v54, %v1677_v52 }
 0x13d   :  { %v1683_v24 = vpop.eup %1682 }
 0x13e   :  { %v478_v27 = vmul.f32 %v1683_v24, %v325_v55 }
 0x13f   :  { %v1685_v30 = vpop.eup %1684 }
 0x140   :  { %v2130_v29 = vadd.f32 %v479_v61, %v478_v27 }
 0x142   :  { %1686 = vtanh.f32 %v2130_v29 }
 0x14c   :  { %v1687_v31 = vpop.eup %1686 }
 0x14d   :  { %v482_v32 = vmul.f32 %v1687_v31, %v1685_v30 }
 0x14f   :  { %v483_v33 = vpack.c.bf16 %v482_v32, %v482_v32 }
 0x151   :  { %484 = vst [vmem:[%s2484_s2] sm:$0x3] %v483_v33  ;;  %553 = vmatmul.mubr.bf16.vlgmr.msra.gmra.mrb[4].mxu0 %v483_v33  ;;  %594 = vmatmul.mubr.bf16.vlgmr.msra.gmra.mrb[4].mxu1 %v483_v33 }
 0x152   :  { %681 = vmatpush1.bf16.msra.mxu0 %v1992_v58  ;;  %722 = vmatpush1.bf16.msra.mxu1 %v2006_v0 }
 0x153   :  { %682 = vmatprep.subr.bf16.mxu0 %v1994_v59  ;;  %723 = vmatprep.subr.bf16.mxu1 %v2008_v1 }
 0x154   :  { %712 = vmatprep.mubr.bf16.mxu0 %v1802_v60  ;;  %753 = vmatprep.mubr.bf16.mxu1 %v1802_v60 }
 0x156   :  { %683 = vmatpush1.bf16.msra.mxu0 %v2003_v63  ;;  %724 = vmatpush1.bf16.msra.mxu1 %v2014_v3 }
 0x157   :  { %684 = vmatprep.subr.bf16.mxu0 %v2010_v2  ;;  %725 = vmatprep.subr.bf16.mxu1 %v2017_v4 }
 0x15a   :  { %685 = vmatpush1.bf16.msra.mxu0 %v2020_v5  ;;  %726 = vmatpush1.bf16.msra.mxu1 %v2026_v7 }
 0x15b   :  { %686 = vmatprep.subr.bf16.mxu0 %v2022_v6  ;;  %727 = vmatprep.subr.bf16.mxu1 %v2029_v8 }
 0x15e   :  { %687 = vmatpush1.bf16.msra.mxu0 %v2032_v9  ;;  %728 = vmatpush1.bf16.msra.mxu1 %v2038_v11 }
 0x15f   :  { %688 = vmatprep.subr.bf16.mxu0 %v2034_v10  ;;  %729 = vmatprep.subr.bf16.mxu1 %v2041_v12 }
 0x162   :  { %689 = vmatpush1.bf16.msra.mxu0 %v2044_v13  ;;  %730 = vmatpush1.bf16.msra.mxu1 %v2050_v15 }
 0x163   :  { %690 = vmatprep.subr.bf16.mxu0 %v2046_v14  ;;  %731 = vmatprep.subr.bf16.mxu1 %v2053_v16 }
 0x166   :  { %691 = vmatpush1.bf16.msra.mxu0 %v2056_v17  ;;  %732 = vmatpush1.bf16.msra.mxu1 %v2062_v19 }
 0x167   :  { %692 = vmatprep.subr.bf16.mxu0 %v2058_v18  ;;  %733 = vmatprep.subr.bf16.mxu1 %v2065_v20 }
 0x16a   :  { %693 = vmatpush1.bf16.msra.mxu0 %v2068_v21  ;;  %734 = vmatpush1.bf16.msra.mxu1 %v2074_v23 }
 0x16b   :  { %694 = vmatprep.subr.bf16.mxu0 %v2070_v22  ;;  %735 = vmatprep.subr.bf16.mxu1 %v2077_v25 }
 0x16e   :  { %695 = vmatpush1.bf16.msra.mxu0 %v2080_v26  ;;  %736 = vmatpush1.bf16.msra.mxu1 %v2084_v28 }
 0x16f   :  { %840 = vmatprep.subr.bf16.mxu0 %v1990_v57  ;;  %881 = vmatprep.subr.bf16.mxu1 %v1999_v62 }
 0x224   :  { %v554_v34 = vpop.f32.mrb[4].mxu0  ;;  %v595_v35 = vpop.f32.mrb[4].mxu1 }
 0x225   :  { %v556_v37 = vpop.f32.mrb[5].mxu0  ;;  %v597_v38 = vpop.f32.mrb[5].mxu1 }
 0x226   :  { %v606_v39 = vcombine.low %v554_v34, %v556_v37  ;;  %v607_v40 = vcombine.low %v595_v35, %v597_v38  ;;  %v558_v41 = vpop.f32.mrb[6].mxu0  ;;  %v599_v42 = vpop.f32.mrb[6].mxu1 }
 0x227   :  { %v559_v43 = vpop.f32.mrb[7].mxu0  ;;  %v600_v44 = vpop.f32.mrb[7].mxu1 }
 0x228   :  { %v610_v45 = vadd.f32 %v1628_v36, %v606_v39  ;;  %v611_v50 = vadd.f32 %v1629_v46, %v607_v40  ;;  %v1634_v40 = vld [vmem:[%s2482_s0 + $0x20] sm:$0xff] }
 0x22a   :  { %v1630_v47 = vmul.f32 -1.442695, %v610_v45  ;;  %v619_v48 = vrot.slane %v610_v45, 4  ;;  %v629_v51 = vrot.slane %v611_v50, 4 }
 0x22c   :  { %1688 = vpow2.f32 %v1630_v47  ;;  %v1631_v49 = vmul.f32 -1.442695, %v619_v48  ;;  %v1632_v52 = vmul.f32 -1.442695, %v629_v51 }
 0x22e   :  { %1690 = vpow2.f32 %v1631_v49 }
 0x22f   :  { %1692 = vtanh.f32 %v611_v50 }
 0x230   :  { %1694 = vpow2.f32 %v1632_v52 }
 0x236   :  { %v1689_v53 = vpop.eup %1688 }
 0x237   :  { %v615_v54 = vadd.f32 1.0, %v1689_v53 }
 0x238   :  { %v1691_v55 = vpop.eup %1690 }
 0x239   :  { %1696 = vrcp.f32 %v615_v54  ;;  %v624_v56 = vadd.f32 1.0, %v1691_v55  ;;  %v1693_v61 = vpop.eup %1692 }
 0x23a   :  { %v1695_v24 = vpop.eup %1694 }
 0x23b   :  { %1698 = vrcp.f32 %v624_v56  ;;  %v634_v32 = vadd.f32 1.0, %v1695_v24 }
 0x23d   :  { %1700 = vrcp.f32 %v634_v32 }
 0x243   :  { %v1697_v27 = vpop.eup %1696 }
 0x244   :  { %v638_v30 = vmul.f32 %v1697_v27, %v1693_v61 }
 0x245   :  { %v1699_v31 = vpop.eup %1698 }
 0x246   :  { %v637_v33 = vmul.f32 %v1699_v31, %v2130_v29 }
 0x247   :  { %v1701_v35 = vpop.eup %1700 }
 0x248   :  { %v2177_v34 = vadd.f32 %v638_v30, %v637_v33 }
 0x24a   :  { %1702 = vtanh.f32 %v2177_v34 }
 0x254   :  { %v1703_v36 = vpop.eup %1702 }
 0x255   :  { %v641_v37 = vmul.f32 %v1703_v36, %v1701_v35 }
 0x257   :  { %v642_v38 = vpack.c.bf16 %v641_v37, %v641_v37 }
 0x259   :  { %1633 = vst [vmem:[%s2484_s2 + $0x2] sm:$0x3] %v642_v38  ;;  %713 = vmatmul.mubr.bf16.vlgmr.msra.gmra.mrb[8].mxu0 %v642_v38  ;;  %754 = vmatmul.mubr.bf16.vlgmr.msra.gmra.mrb[8].mxu1 %v642_v38 }
 0x25a   :  { %841 = vmatpush1.bf16.msra.mxu0 %v1992_v58  ;;  %882 = vmatpush1.bf16.msra.mxu1 %v2006_v0 }
 0x25b   :  { %842 = vmatprep.subr.bf16.mxu0 %v1994_v59  ;;  %883 = vmatprep.subr.bf16.mxu1 %v2008_v1 }
 0x25c   :  { %872 = vmatprep.mubr.bf16.mxu0 %v1802_v60  ;;  %913 = vmatprep.mubr.bf16.mxu1 %v1802_v60 }
 0x25e   :  { %843 = vmatpush1.bf16.msra.mxu0 %v2003_v63  ;;  %884 = vmatpush1.bf16.msra.mxu1 %v2014_v3 }
 0x25f   :  { %844 = vmatprep.subr.bf16.mxu0 %v2010_v2  ;;  %885 = vmatprep.subr.bf16.mxu1 %v2017_v4 }
 0x262   :  { %845 = vmatpush1.bf16.msra.mxu0 %v2020_v5  ;;  %886 = vmatpush1.bf16.msra.mxu1 %v2026_v7 }
 0x263   :  { %846 = vmatprep.subr.bf16.mxu0 %v2022_v6  ;;  %887 = vmatprep.subr.bf16.mxu1 %v2029_v8 }
 0x266   :  { %847 = vmatpush1.bf16.msra.mxu0 %v2032_v9  ;;  %888 = vmatpush1.bf16.msra.mxu1 %v2038_v11 }
 0x267   :  { %848 = vmatprep.subr.bf16.mxu0 %v2034_v10  ;;  %889 = vmatprep.subr.bf16.mxu1 %v2041_v12 }
 0x26a   :  { %849 = vmatpush1.bf16.msra.mxu0 %v2044_v13  ;;  %890 = vmatpush1.bf16.msra.mxu1 %v2050_v15 }
 0x26b   :  { %850 = vmatprep.subr.bf16.mxu0 %v2046_v14  ;;  %891 = vmatprep.subr.bf16.mxu1 %v2053_v16 }
 0x26e   :  { %851 = vmatpush1.bf16.msra.mxu0 %v2056_v17  ;;  %892 = vmatpush1.bf16.msra.mxu1 %v2062_v19 }
 0x26f   :  { %852 = vmatprep.subr.bf16.mxu0 %v2058_v18  ;;  %893 = vmatprep.subr.bf16.mxu1 %v2065_v20 }
 0x272   :  { %853 = vmatpush1.bf16.msra.mxu0 %v2068_v21  ;;  %894 = vmatpush1.bf16.msra.mxu1 %v2074_v23 }
 0x273   :  { %854 = vmatprep.subr.bf16.mxu0 %v2070_v22  ;;  %895 = vmatprep.subr.bf16.mxu1 %v2077_v25 }
 0x276   :  { %855 = vmatpush1.bf16.msra.mxu0 %v2080_v26  ;;  %896 = vmatpush1.bf16.msra.mxu1 %v2084_v28 }
 0x277   :  { %1000 = vmatprep.subr.bf16.mxu0 %v1990_v57  ;;  %1041 = vmatprep.subr.bf16.mxu1 %v1999_v62  ;;  %v1635_v57 = vld [vmem:[%s2482_s0 + $0x28] sm:$0xff] }
 0x32c   :  { %v714_v29 = vpop.f32.mrb[8].mxu0  ;;  %v755_v39 = vpop.f32.mrb[8].mxu1 }
 0x32d   :  { %v716_v41 = vpop.f32.mrb[9].mxu0  ;;  %v757_v42 = vpop.f32.mrb[9].mxu1 }
 0x32e   :  { %v766_v43 = vcombine.low %v714_v29, %v716_v41  ;;  %v767_v44 = vcombine.low %v755_v39, %v757_v42  ;;  %v718_v45 = vpop.f32.mrb[10].mxu0  ;;  %v759_v46 = vpop.f32.mrb[10].mxu1 }
 0x32f   :  { %v719_v47 = vpop.f32.mrb[11].mxu0  ;;  %v760_v48 = vpop.f32.mrb[11].mxu1 }
 0x330   :  { %v770_v49 = vadd.f32 %v1634_v40, %v766_v43  ;;  %v771_v53 = vadd.f32 %v1635_v57, %v767_v44 }
 0x332   :  { %v1636_v50 = vmul.f32 -1.442695, %v770_v49  ;;  %v779_v51 = vrot.slane %v770_v49, 4  ;;  %v789_v54 = vrot.slane %v771_v53, 4 }
 0x334   :  { %1704 = vpow2.f32 %v1636_v50  ;;  %v1637_v52 = vmul.f32 -1.442695, %v779_v51  ;;  %v1638_v55 = vmul.f32 -1.442695, %v789_v54 }
 0x336   :  { %1706 = vpow2.f32 %v1637_v52 }
 0x337   :  { %1708 = vtanh.f32 %v771_v53 }
 0x338   :  { %1710 = vpow2.f32 %v1638_v55 }
 0x33e   :  { %v1705_v56 = vpop.eup %1704 }
 0x33f   :  { %v775_v61 = vadd.f32 1.0, %v1705_v56 }
 0x340   :  { %v1707_v24 = vpop.eup %1706 }
 0x341   :  { %1712 = vrcp.f32 %v775_v61  ;;  %v784_v27 = vadd.f32 1.0, %v1707_v24  ;;  %v1709_v30 = vpop.eup %1708  ;;  %v2329_v61 = vld [vmem:[#allocation4 + $0xa0] sm:$0xff]  ;;  %v2332_v24 = vld [vmem:[#allocation4 + $0xc8] sm:$0xff] }
 0x342   :  { %v1711_v31 = vpop.eup %1710 }
 0x343   :  { %1714 = vrcp.f32 %v784_v27  ;;  %v794_v36 = vadd.f32 1.0, %v1711_v31  ;;  %v2336_v27 = vld [vmem:[#allocation4 + $0xc0] sm:$0xff] }
 0x344   :  { %v2342_v31 = vld [vmem:[#allocation4 + $0xe0] sm:$0xff] }
 0x345   :  { %1716 = vrcp.f32 %v794_v36 }
 0x34b   :  { %v1713_v32 = vpop.eup %1712 }
 0x34c   :  { %v798_v33 = vmul.f32 %v1713_v32, %v1709_v30  ;;  %v2338_v30 = vld [vmem:[#allocation4 + $0xe8] sm:$0xff] }
 0x34d   :  { %v1715_v35 = vpop.eup %1714 }
 0x34e   :  { %v797_v37 = vmul.f32 %v1715_v35, %v2177_v34  ;;  %v1646_v35 = vld [vmem:[%s2482_s0 + $0x40] sm:$0xff] }
 0x34f   :  { %v1717_v29 = vpop.eup %1716 }
 0x350   :  { %v2224_v38 = vadd.f32 %v798_v33, %v797_v37 }
 0x352   :  { %1718 = vtanh.f32 %v2224_v38 }
 0x35c   :  { %v1719_v39 = vpop.eup %1718 }
 0x35d   :  { %v801_v40 = vmul.f32 %v1719_v39, %v1717_v29 }
 0x35f   :  { %v802_v41 = vpack.c.bf16 %v801_v40, %v801_v40 }
 0x361   :  { %1639 = vst [vmem:[%s2484_s2 + $0x4] sm:$0x3] %v802_v41  ;;  %873 = vmatmul.mubr.bf16.vlgmr.msra.gmra.mrb[12].mxu0 %v802_v41  ;;  %914 = vmatmul.mubr.bf16.vlgmr.msra.gmra.mrb[12].mxu1 %v802_v41 }
 0x362   :  { %1001 = vmatpush1.bf16.msra.mxu0 %v1992_v58  ;;  %1042 = vmatpush1.bf16.msra.mxu1 %v2006_v0 }
 0x363   :  { %1002 = vmatprep.subr.bf16.mxu0 %v1994_v59  ;;  %1043 = vmatprep.subr.bf16.mxu1 %v2008_v1 }
 0x364   :  { %1032 = vmatprep.mubr.bf16.mxu0 %v1802_v60  ;;  %1073 = vmatprep.mubr.bf16.mxu1 %v1802_v60 }
 0x366   :  { %1003 = vmatpush1.bf16.msra.mxu0 %v2003_v63  ;;  %1044 = vmatpush1.bf16.msra.mxu1 %v2014_v3  ;;  %v1640_v63 = vld [vmem:[%s2482_s0 + $0x30] sm:$0xff] }
 0x367   :  { %1004 = vmatprep.subr.bf16.mxu0 %v2010_v2  ;;  %1045 = vmatprep.subr.bf16.mxu1 %v2017_v4 }
 0x36a   :  { %1005 = vmatpush1.bf16.msra.mxu0 %v2020_v5  ;;  %1046 = vmatpush1.bf16.msra.mxu1 %v2026_v7 }
 0x36b   :  { %1006 = vmatprep.subr.bf16.mxu0 %v2022_v6  ;;  %1047 = vmatprep.subr.bf16.mxu1 %v2029_v8 }
 0x36e   :  { %1007 = vmatpush1.bf16.msra.mxu0 %v2032_v9  ;;  %1048 = vmatpush1.bf16.msra.mxu1 %v2038_v11 }
 0x36f   :  { %1008 = vmatprep.subr.bf16.mxu0 %v2034_v10  ;;  %1049 = vmatprep.subr.bf16.mxu1 %v2041_v12 }
 0x372   :  { %1009 = vmatpush1.bf16.msra.mxu0 %v2044_v13  ;;  %1050 = vmatpush1.bf16.msra.mxu1 %v2050_v15 }
 0x373   :  { %1010 = vmatprep.subr.bf16.mxu0 %v2046_v14  ;;  %1051 = vmatprep.subr.bf16.mxu1 %v2053_v16 }
 0x376   :  { %1011 = vmatpush1.bf16.msra.mxu0 %v2056_v17  ;;  %1052 = vmatpush1.bf16.msra.mxu1 %v2062_v19 }
 0x377   :  { %1012 = vmatprep.subr.bf16.mxu0 %v2058_v18  ;;  %1053 = vmatprep.subr.bf16.mxu1 %v2065_v20 }
 0x37a   :  { %1013 = vmatpush1.bf16.msra.mxu0 %v2068_v21  ;;  %1054 = vmatpush1.bf16.msra.mxu1 %v2074_v23  ;;  %v1641_v21 = vld [vmem:[%s2482_s0 + $0x38] sm:$0xff] }
 0x37b   :  { %1014 = vmatprep.subr.bf16.mxu0 %v2070_v22  ;;  %1055 = vmatprep.subr.bf16.mxu1 %v2077_v25 }
 0x37e   :  { %1015 = vmatpush1.bf16.msra.mxu0 %v2080_v26  ;;  %1056 = vmatpush1.bf16.msra.mxu1 %v2084_v28 }
 0x37f   :  { %1201 = vmatprep.subr.bf16.mxu1 %v1999_v62 }
 0x434   :  { %v874_v58 = vpop.f32.mrb[12].mxu0  ;;  %v915_v59 = vpop.f32.mrb[12].mxu1 }
 0x435   :  { %v876_v2 = vpop.f32.mrb[13].mxu0  ;;  %v917_v5 = vpop.f32.mrb[13].mxu1 }
 0x436   :  { %v926_v6 = vcombine.low %v874_v58, %v876_v2  ;;  %v927_v9 = vcombine.low %v915_v59, %v917_v5  ;;  %v878_v10 = vpop.f32.mrb[14].mxu0  ;;  %v919_v13 = vpop.f32.mrb[14].mxu1 }
 0x437   :  { %v879_v14 = vpop.f32.mrb[15].mxu0  ;;  %v920_v17 = vpop.f32.mrb[15].mxu1 }
 0x438   :  { %v930_v18 = vadd.f32 %v1640_v63, %v926_v6  ;;  %v931_v26 = vadd.f32 %v1641_v21, %v927_v9  ;;  %v1647_v63 = vld [vmem:[%s2482_s0 + $0x48] sm:$0xff] }
 0x43a   :  { %v1642_v62 = vmul.f32 -1.442695, %v930_v18  ;;  %v939_v22 = vrot.slane %v930_v18, 4  ;;  %v949_v28 = vrot.slane %v931_v26, 4 }
 0x43c   :  { %1720 = vpow2.f32 %v1642_v62  ;;  %v1643_v25 = vmul.f32 -1.442695, %v939_v22  ;;  %v1644_v34 = vmul.f32 -1.442695, %v949_v28 }
 0x43e   :  { %1722 = vpow2.f32 %v1643_v25 }
 0x43f   :  { %1724 = vtanh.f32 %v931_v26 }
 0x440   :  { %1726 = vpow2.f32 %v1644_v34 }
 0x446   :  { %v1721_v42 = vpop.eup %1720 }
 0x447   :  { %v935_v43 = vadd.f32 1.0, %v1721_v42 }
 0x448   :  { %v1723_v44 = vpop.eup %1722 }
 0x449   :  { %1728 = vrcp.f32 %v935_v43  ;;  %v944_v45 = vadd.f32 1.0, %v1723_v44  ;;  %v1725_v46 = vpop.eup %1724 }
 0x44a   :  { %v1727_v47 = vpop.eup %1726 }
 0x44b   :  { %1730 = vrcp.f32 %v944_v45  ;;  %v954_v50 = vadd.f32 1.0, %v1727_v47 }
 0x44d   :  { %1732 = vrcp.f32 %v954_v50  ;;  %v2383_v50 = vld [vmem:[#allocation4 + $0x30] sm:$0xff] }
 0x453   :  { %v1729_v48 = vpop.eup %1728 }
 0x454   :  { %v958_v49 = vmul.f32 %v1729_v48, %v1725_v46  ;;  %v1291_v48 = vld [vmem:[#allocation4 + $0x18] sm:$0xff] }
 0x455   :  { %v1731_v57 = vpop.eup %1730 }
 0x456   :  { %v957_v51 = vmul.f32 %v1731_v57, %v2224_v38  ;;  %v2380_v57 = vld [vmem:[#allocation4 + $0x38] sm:$0xff] }
 0x457   :  { %v1733_v53 = vpop.eup %1732 }
 0x458   :  { %v2270_v52 = vadd.f32 %v958_v49, %v957_v51  ;;  %v2377_v49 = vld [vmem:[#allocation4 + $0x10] sm:$0xff]  ;;  %v2386_v51 = vld [vmem:[#allocation4 + $0x58] sm:$0xff] }
 0x45a   :  { %1734 = vtanh.f32 %v2270_v52 }
 0x464   :  { %v1735_v54 = vpop.eup %1734 }
 0x465   :  { %v961_v55 = vmul.f32 %v1735_v54, %v1733_v53  ;;  %v2392_v53 = vld [vmem:[#allocation4 + $0x78] sm:$0xff]  ;;  %v2395_v54 = vld [vmem:[#allocation4 + $0x70] sm:$0xff] }
 0x467   :  { %v962_v56 = vpack.c.bf16 %v961_v55, %v961_v55  ;;  %v2398_v55 = vld [vmem:[#allocation4 + $0x98] sm:$0xff] }
 0x469   :  { %1645 = vst [vmem:[%s2484_s2 + $0x6] sm:$0x3] %v962_v56  ;;  %1033 = vmatmul.mubr.bf16.vlgmr.msra.gmra.mrb[16].mxu0 %v962_v56  ;;  %1074 = vmatmul.mubr.bf16.vlgmr.msra.gmra.mrb[16].mxu1 %v962_v56  ;;  %v2400_v56 = vld [vmem:[#allocation4 + $0x90] sm:$0xff] }
 0x46a   :  { %1202 = vmatpush1.bf16.msra.mxu1 %v2006_v0  ;;  %1192 = vmatprep.mubr.bf16.mxu0 %v1802_v60  ;;  %v2291_v0 = vld [vmem:[#allocation4 + $0x8] sm:$0xff] }
 0x46b   :  { %1203 = vmatprep.subr.bf16.mxu1 %v2008_v1  ;;  %1233 = vmatprep.mubr.bf16.mxu1 %v1802_v60  ;;  %v2294_v1 = vld [vmem:[#allocation4] sm:$0xff] }
 0x46c   :  { %1160 = vmatprep.subr.bf16.mxu0 %v2291_v0 }
 0x46d   :  { %1161 = vmatpush1.bf16.msra.mxu0 %v2294_v1 }
 0x46e   :  { %1204 = vmatpush1.bf16.msra.mxu1 %v2014_v3  ;;  %v2297_v3 = vld [vmem:[#allocation4 + $0x28] sm:$0xff] }
 0x46f   :  { %1205 = vmatprep.subr.bf16.mxu1 %v2017_v4  ;;  %1162 = vmatprep.subr.bf16.mxu0 %v2297_v3  ;;  %v2300_v4 = vld [vmem:[#allocation4 + $0x20] sm:$0xff] }
 0x471   :  { %1163 = vmatpush1.bf16.msra.mxu0 %v2300_v4 }
 0x472   :  { %1206 = vmatpush1.bf16.msra.mxu1 %v2026_v7  ;;  %v2303_v7 = vld [vmem:[#allocation4 + $0x48] sm:$0xff] }
 0x473   :  { %1207 = vmatprep.subr.bf16.mxu1 %v2029_v8  ;;  %1164 = vmatprep.subr.bf16.mxu0 %v2303_v7  ;;  %v2306_v8 = vld [vmem:[#allocation4 + $0x40] sm:$0xff] }
 0x475   :  { %1165 = vmatpush1.bf16.msra.mxu0 %v2306_v8 }
 0x476   :  { %1208 = vmatpush1.bf16.msra.mxu1 %v2038_v11  ;;  %v2309_v11 = vld [vmem:[#allocation4 + $0x68] sm:$0xff] }
 0x477   :  { %1209 = vmatprep.subr.bf16.mxu1 %v2041_v12  ;;  %1166 = vmatprep.subr.bf16.mxu0 %v2309_v11  ;;  %v2312_v12 = vld [vmem:[#allocation4 + $0x60] sm:$0xff] }
 0x479   :  { %1167 = vmatpush1.bf16.msra.mxu0 %v2312_v12 }
 0x47a   :  { %1210 = vmatpush1.bf16.msra.mxu1 %v2050_v15  ;;  %v2315_v15 = vld [vmem:[#allocation4 + $0x88] sm:$0xff] }
 0x47b   :  { %1211 = vmatprep.subr.bf16.mxu1 %v2053_v16  ;;  %v2317_v16 = vld [vmem:[#allocation4 + $0x80] sm:$0xff]  ;;  %1168 = vmatprep.subr.bf16.mxu0 %v2315_v15 }
 0x47d   :  { %1169 = vmatpush1.bf16.msra.mxu0 %v2317_v16 }
 0x47e   :  { %1212 = vmatpush1.bf16.msra.mxu1 %v2062_v19  ;;  %v2320_v19 = vld [vmem:[#allocation4 + $0xa8] sm:$0xff] }
 0x47f   :  { %1213 = vmatprep.subr.bf16.mxu1 %v2065_v20  ;;  %v2322_v20 = vld [vmem:[#allocation4 + $0xf8] sm:$0xff]  ;;  %1170 = vmatprep.subr.bf16.mxu0 %v2320_v19 }
 0x481   :  { %1171 = vmatpush1.bf16.msra.mxu0 %v2329_v61 }
 0x482   :  { %1214 = vmatpush1.bf16.msra.mxu1 %v2074_v23  ;;  %v2326_v23 = vld [vmem:[#allocation4 + $0xf0] sm:$0xff]  ;;  %1172 = vmatprep.subr.bf16.mxu0 %v2332_v24 }
 0x483   :  { %1215 = vmatprep.subr.bf16.mxu1 %v2322_v20 }
 0x485   :  { %1173 = vmatpush1.bf16.msra.mxu0 %v2336_v27 }
 0x486   :  { %1216 = vmatpush1.bf16.msra.mxu1 %v2326_v23  ;;  %1174 = vmatprep.subr.bf16.mxu0 %v2338_v30 }
 0x487   :  { %1361 = vmatprep.subr.bf16.mxu1 %v1291_v48 }
 0x489   :  { %1175 = vmatpush1.bf16.msra.mxu0 %v2342_v31 }
 0x48a   :  { %1320 = vmatprep.subr.bf16.mxu0 %v2291_v0 }
 0x53c   :  { %v1034_v32 = vpop.f32.mrb[16].mxu0  ;;  %v1075_v33 = vpop.f32.mrb[16].mxu1 }
 0x53d   :  { %v1036_v36 = vpop.f32.mrb[17].mxu0  ;;  %v1077_v37 = vpop.f32.mrb[17].mxu1 }
 0x53e   :  { %v1086_v38 = vcombine.low %v1034_v32, %v1036_v36  ;;  %v1087_v29 = vcombine.low %v1075_v33, %v1077_v37  ;;  %v1038_v39 = vpop.f32.mrb[18].mxu0  ;;  %v1079_v40 = vpop.f32.mrb[18].mxu1  ;;  %v2407_v32 = vld [vmem:[#allocation4 + $0xb0] sm:$0xff]  ;;  %v2409_v33 = vld [vmem:[#allocation4 + $0xd8] sm:$0xff] }
 0x53f   :  { %v1039_v41 = vpop.f32.mrb[19].mxu0  ;;  %v1080_v58 = vpop.f32.mrb[19].mxu1 }
 0x540   :  { %v1090_v59 = vadd.f32 %v1646_v35, %v1086_v38  ;;  %v1091_v9 = vadd.f32 %v1647_v63, %v1087_v29  ;;  %v2413_v35 = vld [vmem:[#allocation4 + $0xd0] sm:$0xff]  ;;  %v1652_v38 = vld [vmem:[%s2482_s0 + $0x50] sm:$0xff] }
 0x542   :  { %v1648_v2 = vmul.f32 -1.442695, %v1090_v59  ;;  %v1099_v5 = vrot.slane %v1090_v59, 4  ;;  %v1109_v10 = vrot.slane %v1091_v9, 4 }
 0x544   :  { %1736 = vpow2.f32 %v1648_v2  ;;  %v1649_v6 = vmul.f32 -1.442695, %v1099_v5  ;;  %v1650_v13 = vmul.f32 -1.442695, %v1109_v10 }
 0x546   :  { %1738 = vpow2.f32 %v1649_v6  ;;  %v1653_v6 = vld [vmem:[%s2482_s0 + $0x58] sm:$0xff] }
 0x547   :  { %1740 = vtanh.f32 %v1091_v9 }
 0x548   :  { %1742 = vpow2.f32 %v1650_v13 }
 0x54e   :  { %v1737_v14 = vpop.eup %1736 }
 0x54f   :  { %v1095_v17 = vadd.f32 1.0, %v1737_v14 }
 0x550   :  { %v1739_v18 = vpop.eup %1738 }
 0x551   :  { %1744 = vrcp.f32 %v1095_v17  ;;  %v1104_v21 = vadd.f32 1.0, %v1739_v18  ;;  %v1741_v62 = vpop.eup %1740 }
 0x552   :  { %v1743_v22 = vpop.eup %1742 }
 0x553   :  { %1746 = vrcp.f32 %v1104_v21  ;;  %v1114_v34 = vadd.f32 1.0, %v1743_v22 }
 0x555   :  { %1748 = vrcp.f32 %v1114_v34 }
 0x55b   :  { %v1745_v25 = vpop.eup %1744 }
 0x55c   :  { %v1118_v26 = vmul.f32 %v1745_v25, %v1741_v62 }
 0x55d   :  { %v1747_v28 = vpop.eup %1746 }
 0x55e   :  { %v1117_v42 = vmul.f32 %v1747_v28, %v2270_v52  ;;  %v2389_v52 = vld [vmem:[#allocation4 + $0x50] sm:$0xff] }
 0x55f   :  { %v1749_v44 = vpop.eup %1748 }
 0x560   :  { %v2353_v43 = vadd.f32 %v1118_v26, %v1117_v42 }
 0x562   :  { %1750 = vtanh.f32 %v2353_v43 }
 0x56c   :  { %v1751_v45 = vpop.eup %1750 }
 0x56d   :  { %v1121_v46 = vmul.f32 %v1751_v45, %v1749_v44 }
 0x56f   :  { %v1122_v47 = vpack.c.bf16 %v1121_v46, %v1121_v46 }
 0x571   :  { %1651 = vst [vmem:[%s2484_s2 + $0x8] sm:$0x3] %v1122_v47  ;;  %1193 = vmatmul.mubr.bf16.vlgmr.msra.gmra.mrb[20].mxu0 %v1122_v47  ;;  %1234 = vmatmul.mubr.bf16.vlgmr.msra.gmra.mrb[20].mxu1 %v1122_v47 }
 0x572   :  { %1321 = vmatpush1.bf16.msra.mxu0 %v2294_v1  ;;  %1352 = vmatprep.mubr.bf16.mxu0 %v1802_v60 }
 0x573   :  { %1322 = vmatprep.subr.bf16.mxu0 %v2297_v3  ;;  %1393 = vmatprep.mubr.bf16.mxu1 %v1802_v60 }
 0x574   :  { %1362 = vmatpush1.bf16.msra.mxu1 %v2377_v49 }
 0x575   :  { %1363 = vmatprep.subr.bf16.mxu1 %v2380_v57 }
 0x576   :  { %1323 = vmatpush1.bf16.msra.mxu0 %v2300_v4 }
 0x577   :  { %1324 = vmatprep.subr.bf16.mxu0 %v2303_v7 }
 0x578   :  { %1364 = vmatpush1.bf16.msra.mxu1 %v2383_v50 }
 0x579   :  { %1365 = vmatprep.subr.bf16.mxu1 %v2386_v51 }
 0x57a   :  { %1325 = vmatpush1.bf16.msra.mxu0 %v2306_v8 }
 0x57b   :  { %1326 = vmatprep.subr.bf16.mxu0 %v2309_v11 }
 0x57c   :  { %1366 = vmatpush1.bf16.msra.mxu1 %v2389_v52 }
 0x57d   :  { %1367 = vmatprep.subr.bf16.mxu1 %v2392_v53 }
 0x57e   :  { %1327 = vmatpush1.bf16.msra.mxu0 %v2312_v12 }
 0x57f   :  { %1328 = vmatprep.subr.bf16.mxu0 %v2315_v15 }
 0x580   :  { %1368 = vmatpush1.bf16.msra.mxu1 %v2395_v54 }
 0x581   :  { %1369 = vmatprep.subr.bf16.mxu1 %v2398_v55 }
 0x582   :  { %1329 = vmatpush1.bf16.msra.mxu0 %v2317_v16 }
 0x583   :  { %1330 = vmatprep.subr.bf16.mxu0 %v2320_v19 }
 0x584   :  { %1370 = vmatpush1.bf16.msra.mxu1 %v2400_v56 }
 0x586   :  { %1331 = vmatpush1.bf16.msra.mxu0 %v2329_v61 }
 0x587   :  { %1332 = vmatprep.subr.bf16.mxu0 %v2332_v24 }
 0x58a   :  { %1333 = vmatpush1.bf16.msra.mxu0 %v2336_v27 }
 0x58b   :  { %1334 = vmatprep.subr.bf16.mxu0 %v2338_v30 }
 0x58e   :  { %1335 = vmatpush1.bf16.msra.mxu0 %v2342_v31 }
 0x58f   :  { %1480 = vmatprep.subr.bf16.mxu0 %v2291_v0  ;;  %v2403_v0 = vld [vmem:[#allocation4 + $0xb8] sm:$0xff] }
 0x590   :  { %1371 = vmatprep.subr.bf16.mxu1 %v2403_v0 }
 0x591   :  { %1372 = vmatpush1.bf16.msra.mxu1 %v2407_v32 }
 0x592   :  { %1373 = vmatprep.subr.bf16.mxu1 %v2409_v33 }
 0x595   :  { %1374 = vmatpush1.bf16.msra.mxu1 %v2413_v35 }
 0x596   :  { %1375 = vmatprep.subr.bf16.mxu1 %v2322_v20 }
 0x599   :  { %1376 = vmatpush1.bf16.msra.mxu1 %v2326_v23 }
 0x59a   :  { %1521 = vmatprep.subr.bf16.mxu1 %v1291_v48 }
 0x644   :  { %v1194_v36 = vpop.f32.mrb[20].mxu0  ;;  %v1235_v37 = vpop.f32.mrb[20].mxu1 }
 0x645   :  { %v1196_v29 = vpop.f32.mrb[21].mxu0  ;;  %v1237_v39 = vpop.f32.mrb[21].mxu1 }
 0x646   :  { %v1246_v40 = vcombine.low %v1194_v36, %v1196_v29  ;;  %v1247_v41 = vcombine.low %v1235_v37, %v1237_v39  ;;  %v1198_v58 = vpop.f32.mrb[22].mxu0  ;;  %v1239_v59 = vpop.f32.mrb[22].mxu1 }
 0x647   :  { %v1199_v63 = vpop.f32.mrb[23].mxu0  ;;  %v1240_v2 = vpop.f32.mrb[23].mxu1  ;;  %v1664_v59 = vld [vmem:[%s2482_s0 + $0x70] sm:$0xff] }
 0x648   :  { %v1250_v5 = vadd.f32 %v1652_v38, %v1246_v40  ;;  %v1251_v14 = vadd.f32 %v1653_v6, %v1247_v41 }
 0x64a   :  { %v1654_v9 = vmul.f32 -1.442695, %v1250_v5  ;;  %v1259_v10 = vrot.slane %v1250_v5, 4  ;;  %v1269_v17 = vrot.slane %v1251_v14, 4 }
 0x64c   :  { %1752 = vpow2.f32 %v1654_v9  ;;  %v1655_v13 = vmul.f32 -1.442695, %v1259_v10  ;;  %v1656_v18 = vmul.f32 -1.442695, %v1269_v17 }
 0x64e   :  { %1754 = vpow2.f32 %v1655_v13 }
 0x64f   :  { %1756 = vtanh.f32 %v1251_v14 }
 0x650   :  { %1758 = vpow2.f32 %v1656_v18  ;;  %v1665_v18 = vld [vmem:[%s2482_s0 + $0x78] sm:$0xff] }
 0x656   :  { %v1753_v21 = vpop.eup %1752 }
 0x657   :  { %v1255_v62 = vadd.f32 1.0, %v1753_v21 }
 0x658   :  { %v1755_v22 = vpop.eup %1754 }
 0x659   :  { %1760 = vrcp.f32 %v1255_v62  ;;  %v1264_v25 = vadd.f32 1.0, %v1755_v22  ;;  %v1757_v26 = vpop.eup %1756 }
 0x65a   :  { %v1759_v28 = vpop.eup %1758 }
 0x65b   :  { %1762 = vrcp.f32 %v1264_v25  ;;  %v1274_v45 = vadd.f32 1.0, %v1759_v28 }
 0x65d   :  { %1764 = vrcp.f32 %v1274_v45 }
 0x663   :  { %v1761_v34 = vpop.eup %1760 }
 0x664   :  { %v1278_v42 = vmul.f32 %v1761_v34, %v1757_v26 }
 0x665   :  { %v1763_v44 = vpop.eup %1762 }
 0x666   :  { %v1277_v46 = vmul.f32 %v1763_v44, %v2353_v43 }
 0x667   :  { %v1765_v48 = vpop.eup %1764 }
 0x668   :  { %v2425_v47 = vadd.f32 %v1278_v42, %v1277_v46 }
 0x66a   :  { %1766 = vtanh.f32 %v2425_v47 }
 0x674   :  { %v1767_v36 = vpop.eup %1766 }
 0x675   :  { %v1281_v37 = vmul.f32 %v1767_v36, %v1765_v48 }
 0x677   :  { %v1282_v38 = vpack.c.bf16 %v1281_v37, %v1281_v37 }
 0x679   :  { %1657 = vst [vmem:[%s2484_s2 + $0xa] sm:$0x3] %v1282_v38  ;;  %1353 = vmatmul.mubr.bf16.vlgmr.msra.gmra.mrb[24].mxu0 %v1282_v38  ;;  %1394 = vmatmul.mubr.bf16.vlgmr.msra.gmra.mrb[24].mxu1 %v1282_v38 }
 0x67a   :  { %1481 = vmatpush1.bf16.msra.mxu0 %v2294_v1  ;;  %1522 = vmatpush1.bf16.msra.mxu1 %v2377_v49 }
 0x67b   :  { %1482 = vmatprep.subr.bf16.mxu0 %v2297_v3  ;;  %1523 = vmatprep.subr.bf16.mxu1 %v2380_v57  ;;  %v1658_v3 = vld [vmem:[%s2482_s0 + $0x60] sm:$0xff] }
 0x67c   :  { %1512 = vmatprep.mubr.bf16.mxu0 %v1802_v60  ;;  %1553 = vmatprep.mubr.bf16.mxu1 %v1802_v60 }
 0x67e   :  { %1483 = vmatpush1.bf16.msra.mxu0 %v2300_v4  ;;  %1524 = vmatpush1.bf16.msra.mxu1 %v2383_v50 }
 0x67f   :  { %1484 = vmatprep.subr.bf16.mxu0 %v2303_v7  ;;  %1525 = vmatprep.subr.bf16.mxu1 %v2386_v51 }
 0x682   :  { %1485 = vmatpush1.bf16.msra.mxu0 %v2306_v8  ;;  %1526 = vmatpush1.bf16.msra.mxu1 %v2389_v52 }
 0x683   :  { %1486 = vmatprep.subr.bf16.mxu0 %v2309_v11  ;;  %1527 = vmatprep.subr.bf16.mxu1 %v2392_v53 }
 0x686   :  { %1487 = vmatpush1.bf16.msra.mxu0 %v2312_v12  ;;  %1528 = vmatpush1.bf16.msra.mxu1 %v2395_v54 }
 0x687   :  { %1488 = vmatprep.subr.bf16.mxu0 %v2315_v15  ;;  %1529 = vmatprep.subr.bf16.mxu1 %v2398_v55 }
 0x68a   :  { %1489 = vmatpush1.bf16.msra.mxu0 %v2317_v16  ;;  %1530 = vmatpush1.bf16.msra.mxu1 %v2400_v56 }
 0x68b   :  { %1490 = vmatprep.subr.bf16.mxu0 %v2320_v19  ;;  %1531 = vmatprep.subr.bf16.mxu1 %v2403_v0 }
 0x68e   :  { %1491 = vmatpush1.bf16.msra.mxu0 %v2329_v61  ;;  %1532 = vmatpush1.bf16.msra.mxu1 %v2407_v32 }
 0x68f   :  { %1492 = vmatprep.subr.bf16.mxu0 %v2332_v24  ;;  %1533 = vmatprep.subr.bf16.mxu1 %v2409_v33 }
 0x692   :  { %1493 = vmatpush1.bf16.msra.mxu0 %v2336_v27  ;;  %1534 = vmatpush1.bf16.msra.mxu1 %v2413_v35 }
 0x693   :  { %1494 = vmatprep.subr.bf16.mxu0 %v2338_v30  ;;  %1535 = vmatprep.subr.bf16.mxu1 %v2322_v20  ;;  %v1659_v20 = vld [vmem:[%s2482_s0 + $0x68] sm:$0xff] }
 0x696   :  { %1495 = vmatpush1.bf16.msra.mxu0 %v2342_v31  ;;  %1536 = vmatpush1.bf16.msra.mxu1 %v2326_v23 }
 0x74c   :  { %v1354_v60 = vpop.f32.mrb[24].mxu0  ;;  %v1395_v1 = vpop.f32.mrb[24].mxu1 }
 0x74d   :  { %v1356_v4 = vpop.f32.mrb[25].mxu0  ;;  %v1397_v7 = vpop.f32.mrb[25].mxu1 }
 0x74e   :  { %v1406_v8 = vcombine.low %v1354_v60, %v1356_v4  ;;  %v1407_v11 = vcombine.low %v1395_v1, %v1397_v7  ;;  %v1358_v12 = vpop.f32.mrb[26].mxu0  ;;  %v1399_v15 = vpop.f32.mrb[26].mxu1 }
 0x74f   :  { %v1359_v16 = vpop.f32.mrb[27].mxu0  ;;  %v1400_v19 = vpop.f32.mrb[27].mxu1 }
 0x750   :  { %v1410_v61 = vadd.f32 %v1658_v3, %v1406_v8  ;;  %v1411_v30 = vadd.f32 %v1659_v20, %v1407_v11 }
 0x752   :  { %v1660_v23 = vmul.f32 -1.442695, %v1410_v61  ;;  %v1419_v24 = vrot.slane %v1410_v61, 4  ;;  %v1429_v31 = vrot.slane %v1411_v30, 4 }
 0x754   :  { %1768 = vpow2.f32 %v1660_v23  ;;  %v1661_v27 = vmul.f32 -1.442695, %v1419_v24  ;;  %v1662_v43 = vmul.f32 -1.442695, %v1429_v31 }
 0x756   :  { %1770 = vpow2.f32 %v1661_v27 }
 0x757   :  { %1772 = vtanh.f32 %v1411_v30 }
 0x758   :  { %1774 = vpow2.f32 %v1662_v43 }
 0x75e   :  { %v1769_v49 = vpop.eup %1768 }
 0x75f   :  { %v1415_v57 = vadd.f32 1.0, %v1769_v49 }
 0x760   :  { %v1771_v50 = vpop.eup %1770 }
 0x761   :  { %1776 = vrcp.f32 %v1415_v57  ;;  %v1424_v51 = vadd.f32 1.0, %v1771_v50  ;;  %v1773_v52 = vpop.eup %1772 }
 0x762   :  { %v1775_v53 = vpop.eup %1774 }
 0x763   :  { %1778 = vrcp.f32 %v1424_v51  ;;  %v1434_v0 = vadd.f32 1.0, %v1775_v53 }
 0x765   :  { %1780 = vrcp.f32 %v1434_v0 }
 0x76b   :  { %v1777_v54 = vpop.eup %1776 }
 0x76c   :  { %v1438_v55 = vmul.f32 %v1777_v54, %v1773_v52 }
 0x76d   :  { %v1779_v56 = vpop.eup %1778 }
 0x76e   :  { %v1437_v32 = vmul.f32 %v1779_v56, %v2425_v47 }
 0x76f   :  { %v1781_v35 = vpop.eup %1780 }
 0x770   :  { %v1439_v33 = vadd.f32 %v1438_v55, %v1437_v32 }
 0x772   :  { %1782 = vtanh.f32 %v1439_v33 }
 0x77c   :  { %v1783_v29 = vpop.eup %1782 }
 0x77d   :  { %v1441_v39 = vmul.f32 %v1783_v29, %v1781_v35 }
 0x77f   :  { %v1442_v40 = vpack.c.bf16 %v1441_v39, %v1441_v39 }
 0x781   :  { %1663 = vst [vmem:[%s2484_s2 + $0xc] sm:$0x3] %v1442_v40  ;;  %1513 = vmatmul.mubr.bf16.vlgmr.msra.gmra.mrb[28].mxu0 %v1442_v40  ;;  %1554 = vmatmul.mubr.bf16.vlgmr.msra.gmra.mrb[28].mxu1 %v1442_v40 }
 0x854   :  { %v1514_v41 = vpop.f32.mrb[28].mxu0  ;;  %v1555_v58 = vpop.f32.mrb[28].mxu1 }
 0x855   :  { %v1516_v63 = vpop.f32.mrb[29].mxu0  ;;  %v1557_v2 = vpop.f32.mrb[29].mxu1 }
 0x856   :  { %v1566_v5 = vcombine.low %v1514_v41, %v1516_v63  ;;  %v1567_v6 = vcombine.low %v1555_v58, %v1557_v2  ;;  %v1518_v9 = vpop.f32.mrb[30].mxu0  ;;  %v1559_v10 = vpop.f32.mrb[30].mxu1 }
 0x857   :  { %v1519_v13 = vpop.f32.mrb[31].mxu0  ;;  %v1560_v14 = vpop.f32.mrb[31].mxu1 }
 0x858   :  { %v1570_v17 = vadd.f32 %v1664_v59, %v1566_v5  ;;  %v1571_v25 = vadd.f32 %v1665_v18, %v1567_v6 }
 0x85a   :  { %v1666_v21 = vmul.f32 -1.442695, %v1570_v17  ;;  %v1579_v62 = vrot.slane %v1570_v17, 4  ;;  %v1589_v26 = vrot.slane %v1571_v25, 4 }
 0x85c   :  { %1784 = vpow2.f32 %v1666_v21  ;;  %v1667_v22 = vmul.f32 -1.442695, %v1579_v62  ;;  %v1668_v28 = vmul.f32 -1.442695, %v1589_v26 }
 0x85e   :  { %1786 = vpow2.f32 %v1667_v22 }
 0x85f   :  { %1788 = vtanh.f32 %v1571_v25 }
 0x860   :  { %1790 = vpow2.f32 %v1668_v28 }
 0x866   :  { %v1785_v34 = vpop.eup %1784 }
 0x867   :  { %v1575_v42 = vadd.f32 1.0, %v1785_v34 }
 0x868   :  { %v1787_v44 = vpop.eup %1786 }
 0x869   :  { %1792 = vrcp.f32 %v1575_v42  ;;  %v1584_v45 = vadd.f32 1.0, %v1787_v44  ;;  %v1789_v46 = vpop.eup %1788 }
 0x86a   :  { %v1791_v47 = vpop.eup %1790 }
 0x86b   :  { %1794 = vrcp.f32 %v1584_v45  ;;  %v1594_v38 = vadd.f32 1.0, %v1791_v47 }
 0x86d   :  { %1796 = vrcp.f32 %v1594_v38 }
 0x873   :  { %v1793_v48 = vpop.eup %1792 }
 0x874   :  { %v1598_v36 = vmul.f32 %v1793_v48, %v1789_v46 }
 0x875   :  { %v1795_v37 = vpop.eup %1794 }
 0x876   :  { %v1597_v60 = vmul.f32 %v1795_v37, %v1439_v33 }
 0x877   :  { %v1797_v3 = vpop.eup %1796 }
 0x878   :  { %v1599_v1 = vadd.f32 %v1598_v36, %v1597_v60 }
 0x87a   :  { %1798 = vtanh.f32 %v1599_v1  ;;  %1606 = vst [vmem:[#allocation3] sm:$0xf] %v1599_v1 }
 0x884   :  { %v1799_v4 = vpop.eup %1798 }
 0x885   :  { %v1601_v7 = vmul.f32 %v1799_v4, %v1797_v3 }
 0x887   :  { %v1602_v8 = vpack.c.bf16 %v1601_v7, %v1601_v7  ;;  %1605 = vst [vmem:[#allocation2] sm:$0xf] %v1601_v7 }
 0x889   :  { %1669 = vst [vmem:[%s2484_s2 + $0xe] sm:$0x3] %v1602_v8 }

</bundles_post_ra>
